<compile_context>
chip_gen: v7x
topology: tpu7x:2x2x1
jax: 0.10.0
libtpu: 0.0.40
codegen_flags: <defaults>
</compile_context>

<pallas_src>
import functools

import jax
import jax.numpy as jnp
from jax import lax
from jax.experimental import pallas as pl
from jax.experimental.pallas import tpu as pltpu


def _round_up(x, m):
    return (x + m - 1) // m * m


def _default_fuse_kx():
    """K=3*C tap fusion feeds the 256-wide MXUs (v6e/v7x); on 128-wide MXUs
    (v2..v5) the lane-concat only adds patch store/reload traffic, so use 9
    accumulating K=C dots there instead."""
    try:
        kind = jax.devices()[0].device_kind.lower()
        if any(t in kind for t in ("v2", "v3", "v4", "v5")):
            return False
    except Exception:
        pass
    return True


# ----------------------------------------------------------------------------
# Pallas kernel: one batch element per grid step.  Both 3x3 convs, the folded
# BN biases, the shortcut, the residual add and both ReLUs happen in-kernel.
# BN scales are pre-folded into the weights in the wrapper.
# ----------------------------------------------------------------------------
def basic_block_kernel(*refs, Ho, Wo, stride, row_tiles, identity, fuse_kx):
    if identity:
        (x_ref, w1_ref, b1_ref, w2_ref, b2_ref, o_ref, pad_ref) = refs
        ws_ref = sc_ref = None
    else:
        (x_ref, w1_ref, b1_ref, w2_ref, b2_ref, ws_ref,
         o_ref, pad_ref, sc_ref) = refs

    Cp = x_ref.shape[-1]          # padded input channels (multiple of 128)
    Pp = o_ref.shape[-1]          # padded output channels (multiple of 128)
    sd = stride if stride > 1 else None

    # Bias loads hoisted out of the tile loops (scales already folded into the
    # bf16 weights in the wrapper).
    b1 = b1_ref[...]              # (1, Pp) f32
    b2 = b2_ref[...]              # (1, Pp) f32  (b2 + b_shortcut when projecting)

    # Zero only the 1-px halo of the conv2 staging scratch (bf16); the interior
    # is fully overwritten every grid step.  Done every step (not program_id==0
    # gated) so it stays correct when the batch axis is sharded across cores.
    zrow = jnp.zeros((1, Wo + 2, Pp), jnp.bfloat16)
    zcol = jnp.zeros((Ho + 2, 1, Pp), jnp.bfloat16)
    pad_ref[pl.ds(0, 1), pl.ds(0, Wo + 2), :] = zrow
    pad_ref[pl.ds(Ho + 1, 1), pl.ds(0, Wo + 2), :] = zrow
    pad_ref[pl.ds(0, Ho + 2), pl.ds(0, 1), :] = zcol
    pad_ref[pl.ds(0, Ho + 2), pl.ds(Wo + 1, 1), :] = zcol

    # ---- phase 1: conv1 (3x3, stride, pad=1) + bn1 + relu -> pad_ref interior
    #      (projection shortcut computed here too, from the resident ky=1/kx=1
    #       strided slice, and stashed in sc_ref)
    for (r0, tr) in row_tiles:
        M = tr * Wo
        acc = None
        mid = None
        for ky in range(3):
            slices = [
                x_ref[pl.ds(stride * r0 + ky, tr, stride=sd),
                      pl.ds(kx, Wo, stride=sd), :].astype(jnp.bfloat16)
                for kx in range(3)
            ]
            if (not identity) and ky == 1:
                mid = slices[1].reshape(M, Cp)       # 1x1 stride-s conv input
            if fuse_kx:
                patch = jnp.concatenate(slices, axis=-1).reshape(M, 3 * Cp)
                d = jnp.dot(patch, w1_ref[ky],
                            preferred_element_type=jnp.float32)
                acc = d if acc is None else acc + d
            else:
                for kx in range(3):
                    d = jnp.dot(slices[kx].reshape(M, Cp), w1_ref[3 * ky + kx],
                                preferred_element_type=jnp.float32)
                    acc = d if acc is None else acc + d
        out1 = jnp.maximum(acc + b1, 0.0).astype(jnp.bfloat16)
        pad_ref[pl.ds(1 + r0, tr), pl.ds(1, Wo), :] = out1.reshape(tr, Wo, Pp)
        if not identity:
            sc = jnp.dot(mid, ws_ref[...], preferred_element_type=jnp.float32)
            sc_ref[pl.ds(r0, tr), pl.ds(0, Wo), :] = sc.reshape(tr, Wo, Pp)

    # ---- phase 2: conv2 (3x3, s=1, pad=1) + bn2 + shortcut + relu -> o_ref
    for (r0, tr) in row_tiles:
        M = tr * Wo
        acc = None
        for ky in range(3):
            slices = [pad_ref[pl.ds(r0 + ky, tr), pl.ds(kx, Wo), :]
                      for kx in range(3)]            # bf16 already
            if fuse_kx:
                patch = jnp.concatenate(slices, axis=-1).reshape(M, 3 * Pp)
                d = jnp.dot(patch, w2_ref[ky],
                            preferred_element_type=jnp.float32)
                acc = d if acc is None else acc + d
            else:
                for kx in range(3):
                    d = jnp.dot(slices[kx].reshape(M, Pp), w2_ref[3 * ky + kx],
                                preferred_element_type=jnp.float32)
                    acc = d if acc is None else acc + d

        if identity:
            # identity shortcut: stride == 1, Cp == Pp; plain residual add
            sc = x_ref[pl.ds(1 + r0, tr), pl.ds(1, Wo), :].reshape(M, Pp)
        else:
            sc = sc_ref[pl.ds(r0, tr), pl.ds(0, Wo), :].reshape(M, Pp)

        out = jnp.maximum(acc + b2 + sc, 0.0)
        o_ref[pl.ds(r0, tr), pl.ds(0, Wo), :] = (
            out.reshape(tr, Wo, Pp).astype(o_ref.dtype))


# ----------------------------------------------------------------------------
# Wrapper / glue
# ----------------------------------------------------------------------------
def _bn_scale_bias(bn, eps=1e-5):
    gamma, beta, mean, var = bn
    scale = gamma / jnp.sqrt(var + eps)
    bias = beta - mean * scale
    return scale, bias


def _pad_bias(bias, ppad):
    n = bias.shape[0]
    return jnp.pad(bias, (0, ppad - n)).reshape(1, ppad).astype(jnp.float32)


def _pack_conv3x3(w_oihw, scale, cpad, ppad, fuse_kx):
    # Fold the BN scale into the output-channel axis, then OIHW ->
    #   fused:   (3, 3*cpad, ppad)  (kx taps along the contraction dim)
    #   unfused: (9,   cpad, ppad)  (one tap per leading index, 3*ky+kx)
    O, I, _, _ = w_oihw.shape
    w = w_oihw * scale[:, None, None, None]
    w = jnp.transpose(w, (2, 3, 1, 0))                        # (3, 3, I, O)
    w = jnp.pad(w, ((0, 0), (0, 0), (0, cpad - I), (0, ppad - O)))
    if fuse_kx:
        return w.reshape(3, 3 * cpad, ppad).astype(jnp.bfloat16)
    return w.reshape(9, cpad, ppad).astype(jnp.bfloat16)


def basic_block_pallas(x_nchw, params, stride, fuse_kx=None):
    N, Cin, H, W = x_nchw.shape
    P = params["w1"].shape[0]
    Ho = (H + 2 - 3) // stride + 1
    Wo = (W + 2 - 3) // stride + 1
    Hp, Wp = H + 2, W + 2
    Cp = _round_up(Cin, 128)         # lane-dense channels
    Pp = _round_up(P, 128)
    identity = params["ws"] is None
    if fuse_kx is None:
        fuse_kx = _default_fuse_kx()

    # Row tiling: target M = TR*Wo in ~[256, 1024] (MXU-friendly), allowing
    # TR = Ho and a remainder tile instead of degrading to TR = 1.
    if Ho * Wo <= 1024:
        TR = Ho
    else:
        TR = min(Ho, max(1, 512 // Wo))
    row_tiles = []
    r = 0
    while r < Ho:
        tr = min(TR, Ho - r)
        row_tiles.append((r, tr))
        r += tr
    row_tiles = tuple(row_tiles)

    # NCHW -> NHWC, 1px spatial halo + channel pad (glue to match the PyTorch
    # layout; a full network would keep NHWC end-to-end and do this in-kernel).
    x = jnp.transpose(x_nchw, (0, 2, 3, 1)).astype(jnp.float32)
    x = jnp.pad(x, ((0, 0), (1, 1), (1, 1), (0, Cp - Cin)))

    s1, b1 = _bn_scale_bias(params["bn1"])
    s2, b2 = _bn_scale_bias(params["bn2"])
    w1 = _pack_conv3x3(params["w1"], s1, Cp, Pp, fuse_kx)
    w2 = _pack_conv3x3(params["w2"], s2, Pp, Pp, fuse_kx)

    args = [x, w1, _pad_bias(b1, Pp), w2]
    in_specs = [
        pl.BlockSpec((pl.Squeezed(), Hp, Wp, Cp), lambda n: (n, 0, 0, 0)),
        pl.BlockSpec(w1.shape, lambda n: (0, 0, 0)),
        pl.BlockSpec((1, Pp), lambda n: (0, 0)),
        pl.BlockSpec(w2.shape, lambda n: (0, 0, 0)),
    ]
    scratch_shapes = [pltpu.VMEM((Ho + 2, Wo + 2, Pp), jnp.bfloat16)]

    if identity:
        args += [_pad_bias(b2, Pp)]
        in_specs += [pl.BlockSpec((1, Pp), lambda n: (0, 0))]
    else:
        ss, bs = _bn_scale_bias(params["bns"])
        # bn2 bias and shortcut-bn bias collapse into a single add.
        args += [_pad_bias(b2 + bs, Pp)]
        in_specs += [pl.BlockSpec((1, Pp), lambda n: (0, 0))]
        ws = jnp.transpose(params["ws"][:, :, 0, 0] * ss[:, None], (1, 0))
        ws = jnp.pad(ws, ((0, Cp - Cin), (0, Pp - P))).astype(jnp.bfloat16)
        args += [ws]
        in_specs += [pl.BlockSpec((Cp, Pp), lambda n: (0, 0))]
        scratch_shapes += [pltpu.VMEM((Ho, Wo, Pp), jnp.float32)]

    kernel = functools.partial(
        basic_block_kernel, Ho=Ho, Wo=Wo, stride=stride,
        row_tiles=row_tiles, identity=identity, fuse_kx=fuse_kx)

    out = pl.pallas_call(
        kernel,
        out_shape=jax.ShapeDtypeStruct((N, Ho, Wo, Pp), jnp.bfloat16),
        grid_spec=pltpu.PrefetchScalarGridSpec(
            num_scalar_prefetch=0,
            grid=(N,),
            in_specs=in_specs,
            out_specs=pl.BlockSpec((pl.Squeezed(), Ho, Wo, Pp),
                                   lambda n: (n, 0, 0, 0)),
            scratch_shapes=scratch_shapes,
        ),
        compiler_params=pltpu.CompilerParams(
            dimension_semantics=("parallel",),      # megacore-shard batch (v7x)
            vmem_limit_bytes=48 * 1024 * 1024,      # fits v7x's 64 MiB VMEM
        ),
    )(*args)

    out = out[..., :P]                               # drop lane padding
    # NOTE: a full network would keep NHWC/bf16 between blocks; the transpose
    # + f32 cast below exist only to match the PyTorch NCHW interface.
    return jnp.transpose(out, (0, 3, 1, 2)).astype(jnp.float32)


# ----------------------------------------------------------------------------
# Deterministic parameter init (shapes from BasicBlock.__init__)
# ----------------------------------------------------------------------------
def init_params(key, in_planes, planes, stride):
    ks = jax.random.split(key, 16)
    p = {}
    p["w1"] = 0.1 * jax.random.normal(ks[0], (planes, in_planes, 3, 3), jnp.float32)
    p["bn1"] = (1.0 + 0.1 * jax.random.normal(ks[1], (planes,), jnp.float32),
                0.1 * jax.random.normal(ks[2], (planes,), jnp.float32),
                0.1 * jax.random.normal(ks[3], (planes,), jnp.float32),
                jax.random.uniform(ks[4], (planes,), jnp.float32, 0.5, 1.5))
    p["w2"] = 0.1 * jax.random.normal(ks[5], (planes, planes, 3, 3), jnp.float32)
    p["bn2"] = (1.0 + 0.1 * jax.random.normal(ks[6], (planes,), jnp.float32),
                0.1 * jax.random.normal(ks[7], (planes,), jnp.float32),
                0.1 * jax.random.normal(ks[8], (planes,), jnp.float32),
                jax.random.uniform(ks[9], (planes,), jnp.float32, 0.5, 1.5))
    if stride != 1 or in_planes != planes:
        p["ws"] = 0.1 * jax.random.normal(ks[10], (planes, in_planes, 1, 1), jnp.float32)
        p["bns"] = (1.0 + 0.1 * jax.random.normal(ks[11], (planes,), jnp.float32),
                    0.1 * jax.random.normal(ks[12], (planes,), jnp.float32),
                    0.1 * jax.random.normal(ks[13], (planes,), jnp.float32),
                    jax.random.uniform(ks[14], (planes,), jnp.float32, 0.5, 1.5))
    else:
        p["ws"] = None
        p["bns"] = None
    return p


# ----------------------------------------------------------------------------
# Pure-JAX reference (for correctness check only)
# ----------------------------------------------------------------------------
def _bn_eval(x, bn, eps=1e-5):
    gamma, beta, mean, var = bn
    g = gamma / jnp.sqrt(var + eps)
    return x * g[None, :, None, None] + (beta - mean * g)[None, :, None, None]


def basic_block_ref(x, p, stride):
    dn = ("NCHW", "OIHW", "NCHW")
    y = lax.conv_general_dilated(x, p["w1"], (stride, stride),
                                 ((1, 1), (1, 1)), dimension_numbers=dn)
    y = jax.nn.relu(_bn_eval(y, p["bn1"]))
    y = lax.conv_general_dilated(y, p["w2"], (1, 1),
                                 ((1, 1), (1, 1)), dimension_numbers=dn)
    y = _bn_eval(y, p["bn2"])
    if p["ws"] is not None:
        s = lax.conv_general_dilated(x, p["ws"], (stride, stride),
                                     ((0, 0), (0, 0)), dimension_numbers=dn)
        s = _bn_eval(s, p["bns"])
    else:
        s = x
    return jax.nn.relu(y + s)


if __name__ == "__main__":
    # NOTE: bf16 weights / activation patches / output (f32 accumulation) ->
    # tolerances loosened vs the pure-f32 reference.
    TOL = dict(atol=6e-2, rtol=6e-2)

    # Case 1: stride=2, in_planes != planes  -> conv+BN projection shortcut
    key = jax.random.PRNGKey(0)
    kx, kp = jax.random.split(key)
    x = jax.random.normal(kx, (2, 4, 16, 16), jnp.float32)
    p = init_params(kp, in_planes=4, planes=8, stride=2)
    out = jax.block_until_ready(basic_block_pallas(x, p, stride=2))
    ref = basic_block_ref(x, p, 2)
    assert out.shape == ref.shape == (2, 8, 8, 8)
    assert jnp.allclose(out, ref, **TOL), float(jnp.max(jnp.abs(out - ref)))

    # Case 2: stride=1, in_planes == planes -> identity shortcut
    p2 = init_params(jax.random.PRNGKey(1), in_planes=8, planes=8, stride=1)
    x2 = jax.random.normal(jax.random.PRNGKey(2), (2, 8, 16, 16), jnp.float32)
    out2 = jax.block_until_ready(basic_block_pallas(x2, p2, stride=1))
    ref2 = basic_block_ref(x2, p2, 1)
    assert out2.shape == ref2.shape == (2, 8, 16, 16)
    assert jnp.allclose(out2, ref2, **TOL), float(jnp.max(jnp.abs(out2 - ref2)))

    print("KERNEL_OK")
</pallas_src>

<mosaic_0001>
module attributes {stable_mosaic.version = 11 : i64} {
  func.func @basic_block_kernel(%arg0: i32, %arg1: memref<1x18x18x128xf32, #tpu.memory_space<vmem>>, %arg2: memref<3x384x128xbf16, #tpu.memory_space<vmem>>, %arg3: memref<1x128xf32, #tpu.memory_space<vmem>>, %arg4: memref<3x384x128xbf16, #tpu.memory_space<vmem>>, %arg5: memref<1x128xf32, #tpu.memory_space<vmem>>, %arg6: memref<128x128xbf16, #tpu.memory_space<vmem>>, %arg7: memref<1x8x8x128xbf16, #tpu.memory_space<vmem>>, %arg8: memref<10x10x128xbf16, #tpu.memory_space<vmem>>, %arg9: memref<8x8x128xf32, #tpu.memory_space<vmem>>) attributes {dimension_semantics = [#tpu.dimension_semantics<parallel>], iteration_bounds = array<i64: 2>, scalar_prefetch = 0 : i64, scratch_operands = 2 : i64, tpu.core_type = #tpu.core_type<tc>, window_params = [{transform_indices = @transform_0, window_bounds = array<i64: 1, 18, 18, 128>}, {pipeline_mode = #tpu.pipeline_mode<synchronous>, transform_indices = @transform_1, window_bounds = array<i64: 3, 384, 128>}, {pipeline_mode = #tpu.pipeline_mode<synchronous>, transform_indices = @transform_2, window_bounds = array<i64: 1, 128>}, {pipeline_mode = #tpu.pipeline_mode<synchronous>, transform_indices = @transform_3, window_bounds = array<i64: 3, 384, 128>}, {pipeline_mode = #tpu.pipeline_mode<synchronous>, transform_indices = @transform_4, window_bounds = array<i64: 1, 128>}, {pipeline_mode = #tpu.pipeline_mode<synchronous>, transform_indices = @transform_5, window_bounds = array<i64: 128, 128>}, {transform_indices = @transform_6, window_bounds = array<i64: 1, 8, 8, 128>}]} {
    %c0 = arith.constant 0 : index
    %c0_0 = arith.constant 0 : index
    %0 = vector.load %arg3[%c0, %c0_0] : memref<1x128xf32, #tpu.memory_space<vmem>>, vector<1x128xf32>
    %c0_1 = arith.constant 0 : index
    %c0_2 = arith.constant 0 : index
    %1 = vector.load %arg5[%c0_1, %c0_2] : memref<1x128xf32, #tpu.memory_space<vmem>>, vector<1x128xf32>
    %cst = arith.constant 0.000000e+00 : bf16
    %2 = vector.broadcast %cst : bf16 to vector<1x10x128xbf16>
    %cst_3 = arith.constant 0.000000e+00 : bf16
    %3 = vector.broadcast %cst_3 : bf16 to vector<10x1x128xbf16>
    %c0_4 = arith.constant 0 : index
    %c0_5 = arith.constant 0 : index
    %c0_6 = arith.constant 0 : index
    %4 = vector.load %arg8[%c0_4, %c0_5, %c0_6] : memref<10x10x128xbf16, #tpu.memory_space<vmem>>, vector<1x10x128xbf16>
    tpu.vector_store %arg8[%c0_4, %c0_5, %c0_6], %2 {strides = array<i32>} : memref<10x10x128xbf16, #tpu.memory_space<vmem>>, vector<1x10x128xbf16>,
    %c9 = arith.constant 9 : index
    %c0_7 = arith.constant 0 : index
    %c0_8 = arith.constant 0 : index
    %5 = vector.load %arg8[%c9, %c0_7, %c0_8] : memref<10x10x128xbf16, #tpu.memory_space<vmem>>, vector<1x10x128xbf16>
    tpu.vector_store %arg8[%c9, %c0_7, %c0_8], %2 {strides = array<i32>} : memref<10x10x128xbf16, #tpu.memory_space<vmem>>, vector<1x10x128xbf16>,
    %c0_9 = arith.constant 0 : index
    %c0_10 = arith.constant 0 : index
    %c0_11 = arith.constant 0 : index
    %6 = vector.load %arg8[%c0_9, %c0_10, %c0_11] : memref<10x10x128xbf16, #tpu.memory_space<vmem>>, vector<10x1x128xbf16>
    tpu.vector_store %arg8[%c0_9, %c0_10, %c0_11], %3 {strides = array<i32>} : memref<10x10x128xbf16, #tpu.memory_space<vmem>>, vector<10x1x128xbf16>,
    %c0_12 = arith.constant 0 : index
    %c9_13 = arith.constant 9 : index
    %c0_14 = arith.constant 0 : index
    %7 = vector.load %arg8[%c0_12, %c9_13, %c0_14] : memref<10x10x128xbf16, #tpu.memory_space<vmem>>, vector<10x1x128xbf16>
    tpu.vector_store %arg8[%c0_12, %c9_13, %c0_14], %3 {strides = array<i32>} : memref<10x10x128xbf16, #tpu.memory_space<vmem>>, vector<10x1x128xbf16>,
    %c0_15 = arith.constant 0 : index
    %c0_16 = arith.constant 0 : index
    %c0_17 = arith.constant 0 : index
    %c0_18 = arith.constant 0 : index
    %8 = tpu.strided_load %arg1[%c0_15, %c0_16, %c0_17, %c0_18] {strides = array<i32: 1, 2, 2, 1>} : memref<1x18x18x128xf32, #tpu.memory_space<vmem>>, vector<1x8x8x128xf32>
    %9 = vector.shape_cast %8 : vector<1x8x8x128xf32> to vector<8x8x128xf32>
    %10 = arith.truncf %9 : vector<8x8x128xf32> to vector<8x8x128xbf16>
    %c0_19 = arith.constant 0 : index
    %c0_20 = arith.constant 0 : index
    %c1 = arith.constant 1 : index
    %c0_21 = arith.constant 0 : index
    %11 = tpu.strided_load %arg1[%c0_19, %c0_20, %c1, %c0_21] {strides = array<i32: 1, 2, 2, 1>} : memref<1x18x18x128xf32, #tpu.memory_space<vmem>>, vector<1x8x8x128xf32>
    %12 = vector.shape_cast %11 : vector<1x8x8x128xf32> to vector<8x8x128xf32>
    %13 = arith.truncf %12 : vector<8x8x128xf32> to vector<8x8x128xbf16>
    %c0_22 = arith.constant 0 : index
    %c0_23 = arith.constant 0 : index
    %c2 = arith.constant 2 : index
    %c0_24 = arith.constant 0 : index
    %14 = tpu.strided_load %arg1[%c0_22, %c0_23, %c2, %c0_24] {strides = array<i32: 1, 2, 2, 1>} : memref<1x18x18x128xf32, #tpu.memory_space<vmem>>, vector<1x8x8x128xf32>
    %15 = vector.shape_cast %14 : vector<1x8x8x128xf32> to vector<8x8x128xf32>
    %16 = arith.truncf %15 : vector<8x8x128xf32> to vector<8x8x128xbf16>
    %17 = tpu.concatenate %10, %13, %16 in 2 : vector<8x8x128xbf16>, vector<8x8x128xbf16>, vector<8x8x128xbf16> -> vector<8x8x384xbf16>
    %18 = vector.shape_cast %17 : vector<8x8x384xbf16> to vector<64x384xbf16>
    %c0_25 = arith.constant 0 : index
    %c0_26 = arith.constant 0 : index
    %c0_27 = arith.constant 0 : index
    %19 = vector.load %arg2[%c0_25, %c0_26, %c0_27] : memref<3x384x128xbf16, #tpu.memory_space<vmem>>, vector<1x384x128xbf16>
    %20 = vector.shape_cast %19 : vector<1x384x128xbf16> to vector<384x128xbf16>
    %cst_28 = arith.constant dense<0.000000e+00> : vector<64x128xf32>
    %21 = tpu.matmul %18, %20, %cst_28 {dimension_numbers = #tpu.dot_dimension_numbers<[1], [0], [0], [1], [0, 0, 1, 1], [], []>} : vector<64x384xbf16>, vector<384x128xbf16>, vector<64x128xf32> -> vector<64x128xf32>
    %c0_29 = arith.constant 0 : index
    %c1_30 = arith.constant 1 : index
    %c0_31 = arith.constant 0 : index
    %c0_32 = arith.constant 0 : index
    %22 = tpu.strided_load %arg1[%c0_29, %c1_30, %c0_31, %c0_32] {strides = array<i32: 1, 2, 2, 1>} : memref<1x18x18x128xf32, #tpu.memory_space<vmem>>, vector<1x8x8x128xf32>
    %23 = vector.shape_cast %22 : vector<1x8x8x128xf32> to vector<8x8x128xf32>
    %24 = arith.truncf %23 : vector<8x8x128xf32> to vector<8x8x128xbf16>
    %c0_33 = arith.constant 0 : index
    %c1_34 = arith.constant 1 : index
    %c1_35 = arith.constant 1 : index
    %c0_36 = arith.constant 0 : index
    %25 = tpu.strided_load %arg1[%c0_33, %c1_34, %c1_35, %c0_36] {strides = array<i32: 1, 2, 2, 1>} : memref<1x18x18x128xf32, #tpu.memory_space<vmem>>, vector<1x8x8x128xf32>
    %26 = vector.shape_cast %25 : vector<1x8x8x128xf32> to vector<8x8x128xf32>
    %27 = arith.truncf %26 : vector<8x8x128xf32> to vector<8x8x128xbf16>
    %c0_37 = arith.constant 0 : index
    %c1_38 = arith.constant 1 : index
    %c2_39 = arith.constant 2 : index
    %c0_40 = arith.constant 0 : index
    %28 = tpu.strided_load %arg1[%c0_37, %c1_38, %c2_39, %c0_40] {strides = array<i32: 1, 2, 2, 1>} : memref<1x18x18x128xf32, #tpu.memory_space<vmem>>, vector<1x8x8x128xf32>
    %29 = vector.shape_cast %28 : vector<1x8x8x128xf32> to vector<8x8x128xf32>
    %30 = arith.truncf %29 : vector<8x8x128xf32> to vector<8x8x128xbf16>
    %31 = vector.shape_cast %27 : vector<8x8x128xbf16> to vector<64x128xbf16>
    %32 = tpu.concatenate %24, %27, %30 in 2 : vector<8x8x128xbf16>, vector<8x8x128xbf16>, vector<8x8x128xbf16> -> vector<8x8x384xbf16>
    %33 = vector.shape_cast %32 : vector<8x8x384xbf16> to vector<64x384xbf16>
    %c1_41 = arith.constant 1 : index
    %c0_42 = arith.constant 0 : index
    %c0_43 = arith.constant 0 : index
    %34 = vector.load %arg2[%c1_41, %c0_42, %c0_43] : memref<3x384x128xbf16, #tpu.memory_space<vmem>>, vector<1x384x128xbf16>
    %35 = vector.shape_cast %34 : vector<1x384x128xbf16> to vector<384x128xbf16>
    %cst_44 = arith.constant dense<0.000000e+00> : vector<64x128xf32>
    %36 = tpu.matmul %33, %35, %cst_44 {dimension_numbers = #tpu.dot_dimension_numbers<[1], [0], [0], [1], [0, 0, 1, 1], [], []>} : vector<64x384xbf16>, vector<384x128xbf16>, vector<64x128xf32> -> vector<64x128xf32>
    %37 = arith.addf %21, %36 : vector<64x128xf32>
    %c0_45 = arith.constant 0 : index
    %c2_46 = arith.constant 2 : index
    %c0_47 = arith.constant 0 : index
    %c0_48 = arith.constant 0 : index
    %38 = tpu.strided_load %arg1[%c0_45, %c2_46, %c0_47, %c0_48] {strides = array<i32: 1, 2, 2, 1>} : memref<1x18x18x128xf32, #tpu.memory_space<vmem>>, vector<1x8x8x128xf32>
    %39 = vector.shape_cast %38 : vector<1x8x8x128xf32> to vector<8x8x128xf32>
    %40 = arith.truncf %39 : vector<8x8x128xf32> to vector<8x8x128xbf16>
    %c0_49 = arith.constant 0 : index
    %c2_50 = arith.constant 2 : index
    %c1_51 = arith.constant 1 : index
    %c0_52 = arith.constant 0 : index
    %41 = tpu.strided_load %arg1[%c0_49, %c2_50, %c1_51, %c0_52] {strides = array<i32: 1, 2, 2, 1>} : memref<1x18x18x128xf32, #tpu.memory_space<vmem>>, vector<1x8x8x128xf32>
    %42 = vector.shape_cast %41 : vector<1x8x8x128xf32> to vector<8x8x128xf32>
    %43 = arith.truncf %42 : vector<8x8x128xf32> to vector<8x8x128xbf16>
    %c0_53 = arith.constant 0 : index
    %c2_54 = arith.constant 2 : index
    %c2_55 = arith.constant 2 : index
    %c0_56 = arith.constant 0 : index
    %44 = tpu.strided_load %arg1[%c0_53, %c2_54, %c2_55, %c0_56] {strides = array<i32: 1, 2, 2, 1>} : memref<1x18x18x128xf32, #tpu.memory_space<vmem>>, vector<1x8x8x128xf32>
    %45 = vector.shape_cast %44 : vector<1x8x8x128xf32> to vector<8x8x128xf32>
    %46 = arith.truncf %45 : vector<8x8x128xf32> to vector<8x8x128xbf16>
    %47 = tpu.concatenate %40, %43, %46 in 2 : vector<8x8x128xbf16>, vector<8x8x128xbf16>, vector<8x8x128xbf16> -> vector<8x8x384xbf16>
    %48 = vector.shape_cast %47 : vector<8x8x384xbf16> to vector<64x384xbf16>
    %c2_57 = arith.constant 2 : index
    %c0_58 = arith.constant 0 : index
    %c0_59 = arith.constant 0 : index
    %49 = vector.load %arg2[%c2_57, %c0_58, %c0_59] : memref<3x384x128xbf16, #tpu.memory_space<vmem>>, vector<1x384x128xbf16>
    %50 = vector.shape_cast %49 : vector<1x384x128xbf16> to vector<384x128xbf16>
    %cst_60 = arith.constant dense<0.000000e+00> : vector<64x128xf32>
    %51 = tpu.matmul %48, %50, %cst_60 {dimension_numbers = #tpu.dot_dimension_numbers<[1], [0], [0], [1], [0, 0, 1, 1], [], []>} : vector<64x384xbf16>, vector<384x128xbf16>, vector<64x128xf32> -> vector<64x128xf32>
    %52 = arith.addf %37, %51 : vector<64x128xf32>
    %53 = vector.broadcast %0 : vector<1x128xf32> to vector<64x128xf32>
    %54 = arith.addf %52, %53 : vector<64x128xf32>
    %cst_61 = arith.constant 0.000000e+00 : f32
    %55 = vector.broadcast %cst_61 : f32 to vector<64x128xf32>
    %56 = arith.maximumf %54, %55 : vector<64x128xf32>
    %57 = arith.truncf %56 : vector<64x128xf32> to vector<64x128xbf16>
    %58 = vector.shape_cast %57 : vector<64x128xbf16> to vector<8x8x128xbf16>
    %c1_62 = arith.constant 1 : index
    %c1_63 = arith.constant 1 : index
    %c0_64 = arith.constant 0 : index
    %59 = vector.load %arg8[%c1_62, %c1_63, %c0_64] : memref<10x10x128xbf16, #tpu.memory_space<vmem>>, vector<8x8x128xbf16>
    tpu.vector_store %arg8[%c1_62, %c1_63, %c0_64], %58 {strides = array<i32>} : memref<10x10x128xbf16, #tpu.memory_space<vmem>>, vector<8x8x128xbf16>,
    %c0_65 = arith.constant 0 : index
    %c0_66 = arith.constant 0 : index
    %60 = vector.load %arg6[%c0_65, %c0_66] : memref<128x128xbf16, #tpu.memory_space<vmem>>, vector<128x128xbf16>
    %cst_67 = arith.constant dense<0.000000e+00> : vector<64x128xf32>
    %61 = tpu.matmul %31, %60, %cst_67 {dimension_numbers = #tpu.dot_dimension_numbers<[1], [0], [0], [1], [0, 0, 1, 1], [], []>} : vector<64x128xbf16>, vector<128x128xbf16>, vector<64x128xf32> -> vector<64x128xf32>
    %62 = vector.shape_cast %61 : vector<64x128xf32> to vector<8x8x128xf32>
    %c0_68 = arith.constant 0 : index
    %c0_69 = arith.constant 0 : index
    %c0_70 = arith.constant 0 : index
    %63 = vector.load %arg9[%c0_68, %c0_69, %c0_70] : memref<8x8x128xf32, #tpu.memory_space<vmem>>, vector<8x8x128xf32>
    tpu.vector_store %arg9[%c0_68, %c0_69, %c0_70], %62 {strides = array<i32>} : memref<8x8x128xf32, #tpu.memory_space<vmem>>, vector<8x8x128xf32>,
    %c0_71 = arith.constant 0 : index
    %c0_72 = arith.constant 0 : index
    %c0_73 = arith.constant 0 : index
    %64 = vector.load %arg8[%c0_71, %c0_72, %c0_73] : memref<10x10x128xbf16, #tpu.memory_space<vmem>>, vector<8x8x128xbf16>
    %c0_74 = arith.constant 0 : index
    %c1_75 = arith.constant 1 : index
    %c0_76 = arith.constant 0 : index
    %65 = vector.load %arg8[%c0_74, %c1_75, %c0_76] : memref<10x10x128xbf16, #tpu.memory_space<vmem>>, vector<8x8x128xbf16>
    %c0_77 = arith.constant 0 : index
    %c2_78 = arith.constant 2 : index
    %c0_79 = arith.constant 0 : index
    %66 = vector.load %arg8[%c0_77, %c2_78, %c0_79] : memref<10x10x128xbf16, #tpu.memory_space<vmem>>, vector<8x8x128xbf16>
    %67 = tpu.concatenate %64, %65, %66 in 2 : vector<8x8x128xbf16>, vector<8x8x128xbf16>, vector<8x8x128xbf16> -> vector<8x8x384xbf16>
    %68 = vector.shape_cast %67 : vector<8x8x384xbf16> to vector<64x384xbf16>
    %c0_80 = arith.constant 0 : index
    %c0_81 = arith.constant 0 : index
    %c0_82 = arith.constant 0 : index
    %69 = vector.load %arg4[%c0_80, %c0_81, %c0_82] : memref<3x384x128xbf16, #tpu.memory_space<vmem>>, vector<1x384x128xbf16>
    %70 = vector.shape_cast %69 : vector<1x384x128xbf16> to vector<384x128xbf16>
    %cst_83 = arith.constant dense<0.000000e+00> : vector<64x128xf32>
    %71 = tpu.matmul %68, %70, %cst_83 {dimension_numbers = #tpu.dot_dimension_numbers<[1], [0], [0], [1], [0, 0, 1, 1], [], []>} : vector<64x384xbf16>, vector<384x128xbf16>, vector<64x128xf32> -> vector<64x128xf32>
    %c1_84 = arith.constant 1 : index
    %c0_85 = arith.constant 0 : index
    %c0_86 = arith.constant 0 : index
    %72 = vector.load %arg8[%c1_84, %c0_85, %c0_86] : memref<10x10x128xbf16, #tpu.memory_space<vmem>>, vector<8x8x128xbf16>
    %c1_87 = arith.constant 1 : index
    %c1_88 = arith.constant 1 : index
    %c0_89 = arith.constant 0 : index
    %73 = vector.load %arg8[%c1_87, %c1_88, %c0_89] : memref<10x10x128xbf16, #tpu.memory_space<vmem>>, vector<8x8x128xbf16>
    %c1_90 = arith.constant 1 : index
    %c2_91 = arith.constant 2 : index
    %c0_92 = arith.constant 0 : index
    %74 = vector.load %arg8[%c1_90, %c2_91, %c0_92] : memref<10x10x128xbf16, #tpu.memory_space<vmem>>, vector<8x8x128xbf16>
    %75 = tpu.concatenate %72, %73, %74 in 2 : vector<8x8x128xbf16>, vector<8x8x128xbf16>, vector<8x8x128xbf16> -> vector<8x8x384xbf16>
    %76 = vector.shape_cast %75 : vector<8x8x384xbf16> to vector<64x384xbf16>
    %c1_93 = arith.constant 1 : index
    %c0_94 = arith.constant 0 : index
    %c0_95 = arith.constant 0 : index
    %77 = vector.load %arg4[%c1_93, %c0_94, %c0_95] : memref<3x384x128xbf16, #tpu.memory_space<vmem>>, vector<1x384x128xbf16>
    %78 = vector.shape_cast %77 : vector<1x384x128xbf16> to vector<384x128xbf16>
    %cst_96 = arith.constant dense<0.000000e+00> : vector<64x128xf32>
    %79 = tpu.matmul %76, %78, %cst_96 {dimension_numbers = #tpu.dot_dimension_numbers<[1], [0], [0], [1], [0, 0, 1, 1], [], []>} : vector<64x384xbf16>, vector<384x128xbf16>, vector<64x128xf32> -> vector<64x128xf32>
    %80 = arith.addf %71, %79 : vector<64x128xf32>
    %c2_97 = arith.constant 2 : index
    %c0_98 = arith.constant 0 : index
    %c0_99 = arith.constant 0 : index
    %81 = vector.load %arg8[%c2_97, %c0_98, %c0_99] : memref<10x10x128xbf16, #tpu.memory_space<vmem>>, vector<8x8x128xbf16>
    %c2_100 = arith.constant 2 : index
    %c1_101 = arith.constant 1 : index
    %c0_102 = arith.constant 0 : index
    %82 = vector.load %arg8[%c2_100, %c1_101, %c0_102] : memref<10x10x128xbf16, #tpu.memory_space<vmem>>, vector<8x8x128xbf16>
    %c2_103 = arith.constant 2 : index
    %c2_104 = arith.constant 2 : index
    %c0_105 = arith.constant 0 : index
    %83 = vector.load %arg8[%c2_103, %c2_104, %c0_105] : memref<10x10x128xbf16, #tpu.memory_space<vmem>>, vector<8x8x128xbf16>
    %84 = tpu.concatenate %81, %82, %83 in 2 : vector<8x8x128xbf16>, vector<8x8x128xbf16>, vector<8x8x128xbf16> -> vector<8x8x384xbf16>
    %85 = vector.shape_cast %84 : vector<8x8x384xbf16> to vector<64x384xbf16>
    %c2_106 = arith.constant 2 : index
    %c0_107 = arith.constant 0 : index
    %c0_108 = arith.constant 0 : index
    %86 = vector.load %arg4[%c2_106, %c0_107, %c0_108] : memref<3x384x128xbf16, #tpu.memory_space<vmem>>, vector<1x384x128xbf16>
    %87 = vector.shape_cast %86 : vector<1x384x128xbf16> to vector<384x128xbf16>
    %cst_109 = arith.constant dense<0.000000e+00> : vector<64x128xf32>
    %88 = tpu.matmul %85, %87, %cst_109 {dimension_numbers = #tpu.dot_dimension_numbers<[1], [0], [0], [1], [0, 0, 1, 1], [], []>} : vector<64x384xbf16>, vector<384x128xbf16>, vector<64x128xf32> -> vector<64x128xf32>
    %89 = arith.addf %80, %88 : vector<64x128xf32>
    %c0_110 = arith.constant 0 : index
    %c0_111 = arith.constant 0 : index
    %c0_112 = arith.constant 0 : index
    %90 = vector.load %arg9[%c0_110, %c0_111, %c0_112] : memref<8x8x128xf32, #tpu.memory_space<vmem>>, vector<8x8x128xf32>
    %91 = vector.shape_cast %90 : vector<8x8x128xf32> to vector<64x128xf32>
    %92 = vector.broadcast %1 : vector<1x128xf32> to vector<64x128xf32>
    %93 = arith.addf %89, %92 : vector<64x128xf32>
    %94 = arith.addf %93, %91 : vector<64x128xf32>
    %cst_113 = arith.constant 0.000000e+00 : f32
    %95 = vector.broadcast %cst_113 : f32 to vector<64x128xf32>
    %96 = arith.maximumf %94, %95 : vector<64x128xf32>
    %97 = vector.shape_cast %96 : vector<64x128xf32> to vector<8x8x128xf32>
    %98 = arith.truncf %97 : vector<8x8x128xf32> to vector<8x8x128xbf16>
    %c0_114 = arith.constant 0 : index
    %c0_115 = arith.constant 0 : index
    %c0_116 = arith.constant 0 : index
    %c0_117 = arith.constant 0 : index
    %99 = vector.load %arg7[%c0_114, %c0_115, %c0_116, %c0_117] : memref<1x8x8x128xbf16, #tpu.memory_space<vmem>>, vector<1x8x8x128xbf16>
    %100 = vector.shape_cast %99 : vector<1x8x8x128xbf16> to vector<8x8x128xbf16>
    %101 = vector.shape_cast %98 : vector<8x8x128xbf16> to vector<1x8x8x128xbf16>
    tpu.vector_store %arg7[%c0_114, %c0_115, %c0_116, %c0_117], %101 {strides = array<i32>} : memref<1x8x8x128xbf16, #tpu.memory_space<vmem>>, vector<1x8x8x128xbf16>,
    return
  }
  func.func @transform_0(%arg0: i32) -> (i32, i32, i32, i32) {
    %c0_i32 = arith.constant 0 : i32
    %c0_i32_0 = arith.constant 0 : i32
    %c0_i32_1 = arith.constant 0 : i32
    %c0_i32_2 = arith.constant 0 : i32
    return %arg0, %c0_i32, %c0_i32_0, %c0_i32_1 : i32, i32, i32, i32
  }
  func.func @transform_1(%arg0: i32) -> (i32, i32, i32) {
    %c0_i32 = arith.constant 0 : i32
    %c0_i32_0 = arith.constant 0 : i32
    %c0_i32_1 = arith.constant 0 : i32
    %c0_i32_2 = arith.constant 0 : i32
    return %c0_i32, %c0_i32_0, %c0_i32_1 : i32, i32, i32
  }
  func.func @transform_2(%arg0: i32) -> (i32, i32) {
    %c0_i32 = arith.constant 0 : i32
    %c0_i32_0 = arith.constant 0 : i32
    %c0_i32_1 = arith.constant 0 : i32
    return %c0_i32, %c0_i32_0 : i32, i32
  }
  func.func @transform_3(%arg0: i32) -> (i32, i32, i32) {
    %c0_i32 = arith.constant 0 : i32
    %c0_i32_0 = arith.constant 0 : i32
    %c0_i32_1 = arith.constant 0 : i32
    %c0_i32_2 = arith.constant 0 : i32
    return %c0_i32, %c0_i32_0, %c0_i32_1 : i32, i32, i32
  }
  func.func @transform_4(%arg0: i32) -> (i32, i32) {
    %c0_i32 = arith.constant 0 : i32
    %c0_i32_0 = arith.constant 0 : i32
    %c0_i32_1 = arith.constant 0 : i32
    return %c0_i32, %c0_i32_0 : i32, i32
  }
  func.func @transform_5(%arg0: i32) -> (i32, i32) {
    %c0_i32 = arith.constant 0 : i32
    %c0_i32_0 = arith.constant 0 : i32
    %c0_i32_1 = arith.constant 0 : i32
    return %c0_i32, %c0_i32_0 : i32, i32
  }
  func.func @transform_6(%arg0: i32) -> (i32, i32, i32, i32) {
    %c0_i32 = arith.constant 0 : i32
    %c0_i32_0 = arith.constant 0 : i32
    %c0_i32_1 = arith.constant 0 : i32
    %c0_i32_2 = arith.constant 0 : i32
    return %arg0, %c0_i32, %c0_i32_0, %c0_i32_1 : i32, i32, i32, i32
  }
}

</mosaic_0001>

<bundles_post_ra>
// kernel: tpu_custom_call.1
= control target key start
LH: loop header
LB: loop body
LE: loop exit
PB: predicated region body
PF: predicated region fallthrough
CT: control target
= control target key end

     0   :  { %11 = vsyncpa [#allocation5], 0  ;;  %s6343_s0 = inlined_call_operand.vmem [shape: f32[2,18,18,128], index: 0, kind: input, shape index: {}]   ;;  %s6344_s1 = inlined_call_operand.vmem [shape: bf16[3,384,128], index: 1, kind: input, shape index: {}]   ;;  %s6345_s2 = inlined_call_operand.vmem [shape: f32[1,128], index: 2, kind: input, shape index: {}]   ;;  %s6346_s3 = inlined_call_operand.vmem [shape: bf16[3,384,128], index: 3, kind: input, shape index: {}]   ;;  %s6347_s4 = inlined_call_operand.vmem [shape: f32[1,128], index: 4, kind: input, shape index: {}]   ;;  %s6348_s5 = inlined_call_operand.vmem [shape: bf16[128,128], index: 5, kind: input, shape index: {}]   ;;  %s6349_s6 = inlined_call_operand.hbm [shape: bf16[2,8,8,128], index: 6, kind: output, shape index: {}]  }
   0x1   :  { %13 = vsyncpa [#allocation5 + $0x1], 0  ;;  %s5359_s21 = smov 0   ;;  %s5361_s22 = smov 0  }
   0x2   :  { %s5363_s23 = smov 0   ;;  %s5365_s24 = smov 0  }
   0x3 LB: > { %s5380_s25 = sadd.s32 4294967295, %s5318_s24   ;;  %s3773_s26 = sadd.s32 4294967294, %s5318_s24   ;;  %s5318_s24 = sphi %s5365_s24, %s6361_s24   ;;  %s5314_s23 = sphi %s5363_s23, %s6360_s23   ;;  %s5310_s22 = sphi %s5361_s22, %s6359_s22   ;;  %s5306_s21 = sphi %s5359_s21, %s6358_s21  }
   0x4   : > { %s5384_s27 = sadd.s32 1, %s5318_s24   ;;  %s157_s28 = sadd.s32 1, %s5314_s23 }
   0x5   : > { %s154_s29 = ssub.s32 %s5318_s24, %s5384_s27  ;;  %p167_p0 = scmp.ne.s32.totalorder %s5314_s23, %s5310_s22 }
   0x6   : > { %p155_p1 = scmp.eq.s32.totalorder %s154_s29, 0  ;;  %p168_p2 = scmp.eq.s32.totalorder %s5380_s25, 1 }
   0x7   : > { %p173_p3 = scmp.ne.s32.totalorder %s5310_s22, %s5306_s21  ;;  %p174_p4 = scmp.eq.s32.totalorder %s3773_s26, 1 }
   0x8   : > { %s5395_s30 = scalar_select %p155_p1, %s5314_s23, %s157_s28  }
   0x9   : > { %p5397_p5 = por %p168_p2, %p167_p0  ;;  %p5401_p6 = por %p174_p4, %p173_p3 }
   0xa   : > { %p3776_p7 = scmp.ge.s32.totalorder %s5318_s24, 1  ;;  %p215_p8 = scmp.lt.s32.totalorder %s5318_s24, 3 }
   0xc   : > { %p216_p9 = pnand %p3776_p7, %p215_p8 }
   0xd   : > { %v5044_v0 = vld [vmem:[%s6344_s1 + $0x100] sm:$0xff] (!%p216_p9)   ;;  %v5047_v3 = vld [vmem:[%s6344_s1 + $0x108] sm:$0xff] (!%p216_p9)   ;;  %v5050_v6 = vld [vmem:[%s6344_s1 + $0x110] sm:$0xff] (!%p216_p9)   ;;  %p245_p10 = scmp.lt.s32.totalorder (!%p216_p9), %s5380_s25, 1  ;;  %vm258_vm0 = vcmask (!%p216_p9), 1040384   ;;  %vm1857_vm5 = vcmask (!%p216_p9), 1043456  }
   0xe   : > { %219 = sbr.rel (%p216_p9) target bundleno = 704 (0x2c0), region = 44  ;;  %v5045_v1 = vld [vmem:[%s6344_s1 + $0x140] sm:$0xff] (!%p216_p9)   ;;  %4397 = vmatprep.subr.bf16.mxu0 (!%p216_p9), %v5044_v0  ;;  %v5048_v4 = vld [vmem:[%s6344_s1 + $0x148] sm:$0xff] (!%p216_p9)   ;;  %v5051_v7 = vld [vmem:[%s6344_s1 + $0x150] sm:$0xff] (!%p216_p9)   ;;  %vm259_vm1 = vsmask.f32 (!%p216_p9), 256 }
   0xf   : > { %v5046_v2 = vld [vmem:[%s6344_s1 + $0xc0] sm:$0xff] (!%p216_p9)   ;;  %4721 = vmatprep.subr.bf16.mxu1 (!%p216_p9), %v5045_v1  ;;  %v5049_v5 = vld [vmem:[%s6344_s1 + $0xc8] sm:$0xff] (!%p216_p9)   ;;  %v5052_v8 = vld [vmem:[%s6344_s1 + $0xd0] sm:$0xff] (!%p216_p9)   ;;  %vm291_vm3 = vsmask.f32 (!%p216_p9), 7938  ;;  %s4373_s18 = sshll.u32 (!%p216_p9), %s5380_s25, 9 }
  0x10   : > { %4398 = vmatpush3.bf16.msra.mxu0 (!%p216_p9), %v5046_v2  ;;  %4722 = vmatpush3.bf16.msra.mxu1 (!%p216_p9), %v5045_v1  ;;  %v5053_v9 = vld [vmem:[%s6344_s1 + $0x118] sm:$0xff] (!%p216_p9)   ;;  %v5056_v12 = vld [vmem:[%s6344_s1 + $0x120] sm:$0xff] (!%p216_p9)   ;;  %v5059_v15 = vld [vmem:[%s6344_s1 + $0x128] sm:$0xff] (!%p216_p9)   ;;  %s6296_s20 = scalar_lea.hbm (!%p216_p9), %s6349_s6, %s4373_s18  ;;  %s5321_s29 = smov (!%p216_p9), [#allocation4]  }
  0x11   : > { %4399 = vmatprep.subr.bf16.mxu0 (!%p216_p9), %v5047_v3  ;;  %4723 = vmatprep.subr.bf16.mxu1 (!%p216_p9), %v5048_v4  ;;  %v5054_v10 = vld [vmem:[%s6344_s1 + $0x158] sm:$0xff] (!%p216_p9)   ;;  %v5057_v13 = vld [vmem:[%s6344_s1 + $0x160] sm:$0xff] (!%p216_p9)   ;;  %v5060_v16 = vld [vmem:[%s6344_s1 + $0x168] sm:$0xff] (!%p216_p9)   ;;  %s5260_s9 = sshll.u32 (!%p216_p9), %s5321_s29, 4  ;;  %s5261_s9 = int_to_ptr.vmem [resolvable:$false] %s5260_s9 }
  0x12   : > { %v5055_v11 = vld [vmem:[%s6344_s1 + $0xd8] sm:$0xff] (!%p216_p9)   ;;  %v5058_v14 = vld [vmem:[%s6344_s1 + $0xe0] sm:$0xff] (!%p216_p9)   ;;  %v5061_v17 = vld [vmem:[%s6344_s1 + $0xe8] sm:$0xff] (!%p216_p9)   ;;  %s5262_s10 = scalar_lea.vmem (!%p216_p9), %s5261_s9, 1024 }
  0x13   : > { %v5062_v18 = vld [vmem:[%s6344_s1 + $0x130] sm:$0xff] (!%p216_p9)   ;;  %v5065_v21 = vld [vmem:[%s6344_s1 + $0x138] sm:$0xff] (!%p216_p9)   ;;  %v5068_v32 = vld [vmem:[%s6344_s1 + $0x40] sm:$0xff] (!%p216_p9)  }
  0x14   : > { %4400 = vmatpush3.bf16.msra.mxu0 (!%p216_p9), %v5049_v5  ;;  %4724 = vmatpush3.bf16.msra.mxu1 (!%p216_p9), %v5048_v4  ;;  %v5063_v19 = vld [vmem:[%s6344_s1 + $0x170] sm:$0xff] (!%p216_p9)   ;;  %v5066_v24 = vld [vmem:[%s6344_s1 + $0x178] sm:$0xff] (!%p216_p9)   ;;  %v5069_v35 = vld [vmem:[%s6344_s1 + $0x80] sm:$0xff] (!%p216_p9)  }
  0x15   : > { %4401 = vmatprep.subr.bf16.mxu0 %v5050_v6  ;;  %4725 = vmatprep.subr.bf16.mxu1 %v5051_v7  ;;  %s246_s28 = scalar_select %p245_p10, %s5380_s25, 1  ;;  %v5064_v20 = vld [vmem:[%s6344_s1 + $0xf0] sm:$0xff]   ;;  %v5067_v28 = vld [vmem:[%s6344_s1 + $0xf8] sm:$0xff]   ;;  %v5070_v38 = vld [vmem:[%s6344_s1] sm:$0xff]  }
  0x16   : > { %v5071_v40 = vld [vmem:[%s6344_s1 + $0x48] sm:$0xff]   ;;  %v5074_v47 = vld [vmem:[%s6344_s1 + $0x50] sm:$0xff]   ;;  %v5077_v51 = vld [vmem:[%s6344_s1 + $0x58] sm:$0xff]  }
  0x17   : > { %s5001_s14 = smul.u32 432, %s246_s28  ;;  %v5072_v41 = vld [vmem:[%s6344_s1 + $0x88] sm:$0xff]   ;;  %v5075_v48 = vld [vmem:[%s6344_s1 + $0x90] sm:$0xff]   ;;  %v5078_v54 = vld [vmem:[%s6344_s1 + $0x98] sm:$0xff]  }
  0x18   : > { %4402 = vmatpush3.bf16.msra.mxu0 %v5052_v8  ;;  %4726 = vmatpush3.bf16.msra.mxu1 %v5051_v7  ;;  %v5073_v43 = vld [vmem:[%s6344_s1 + $0x8] sm:$0xff]   ;;  %v5076_v50 = vld [vmem:[%s6344_s1 + $0x10] sm:$0xff]   ;;  %v5079_v55 = vld [vmem:[%s6344_s1 + $0x18] sm:$0xff]  }
  0x19   : > { %4403 = vmatprep.subr.bf16.mxu0 %v5053_v9  ;;  %4727 = vmatprep.subr.bf16.mxu1 %v5054_v10  ;;  %s5472_s28 = scalar_lea.vmem %s6343_s0, %s5001_s14  ;;  %v5080_v59 = vld [vmem:[%s6344_s1 + $0x60] sm:$0xff]   ;;  %v5083_v1 = vld [vmem:[%s6344_s1 + $0x68] sm:$0xff]   ;;  %vm5736_vm2 = vmand %vm258_vm0, %vm259_vm1  ;;  %s242_s14 = sand.u32 1, %s5310_s22  }
  0x1a   : > { %v3810_v22 = vld [vmem:[%s5472_s28 + $0x19] ss:$2 sm:$0xff]  ;;  %v3811_v23 = vld [vmem:[%s5472_s28 + $0x49] ss:$2 sm:$0xff]  ;;  %v3818_v26 = vld [vmem:[%s5472_s28 + $0x1a] ss:$2 sm:$0xff] }
  0x1b   : > { %v5485_v25 = vpack.c.bf16 %v3811_v23, %v3810_v22  ;;  %v3819_v27 = vld [vmem:[%s5472_s28 + $0x4a] ss:$2 sm:$0xff]  ;;  %v3820_v33 = vld [vmem:[%s5472_s28 + $0x7a] ss:$2 sm:$0xff]  ;;  %v3812_v39 = vld [vmem:[%s5472_s28 + $0x79] ss:$2 sm:$0xff] }
  0x1c   : > { %4404 = vmatpush3.bf16.msra.mxu0 %v5055_v11  ;;  %4728 = vmatpush3.bf16.msra.mxu1 %v5054_v10  ;;  %v3802_v29 = vld [vmem:[%s5472_s28 + $0x18] ss:$2 sm:$0xff]  ;;  %v3803_v30 = vld [vmem:[%s5472_s28 + $0x48] ss:$2 sm:$0xff]  ;;  %v4331_v31 = vpack.c.bf16 %v3819_v27, %v3818_v26  ;;  %v3813_v42 = vld [vmem:[%s5472_s28 + $0xa9] ss:$2 sm:$0xff] }
  0x1d   : > { %4405 = vmatprep.subr.bf16.mxu0 %v5056_v12  ;;  %4729 = vmatprep.subr.bf16.mxu1 %v5057_v13  ;;  %v3821_v34 = vld [vmem:[%s5472_s28 + $0xaa] ss:$2 sm:$0xff]  ;;  %v4329_v36 = vpack.c.bf16 %v3803_v30, %v3802_v29  ;;  %v5517_v44 = vpack.c.bf16 %v3813_v42, %v3812_v39  ;;  %v3814_v52 = vld [vmem:[%s5472_s28 + $0xd9] ss:$2 sm:$0xff]  ;;  %v3815_v53 = vld [vmem:[%s5472_s28 + $0x109] ss:$2 sm:$0xff] }
  0x1e   : > { %859 = vmatprep.mubr.bf16.mxu0 %v5485_v25  ;;  %4737 = vmatprep.mubr.bf16.mxu1 %v4331_v31  ;;  %v4334_v37 = vpack.c.bf16 %v3821_v34, %v3820_v33  ;;  %v3804_v45 = vld [vmem:[%s5472_s28 + $0x78] ss:$2 sm:$0xff]  ;;  %v3805_v46 = vld [vmem:[%s5472_s28 + $0xa8] ss:$2 sm:$0xff]  ;;  %v5542_v56 = vpack.c.bf16 %v3815_v53, %v3814_v52  ;;  %v3816_v63 = vld [vmem:[%s5472_s28 + $0x139] ss:$2 sm:$0xff] }
  0x1f   : > { %v4332_v49 = vpack.c.bf16 %v3805_v46, %v3804_v45  ;;  %v3806_v57 = vld [vmem:[%s5472_s28 + $0xd8] ss:$2 sm:$0xff]  ;;  %v3807_v58 = vld [vmem:[%s5472_s28 + $0x108] ss:$2 sm:$0xff]  ;;  %v3817_v0 = vld [vmem:[%s5472_s28 + $0x169] ss:$2 sm:$0xff] }
  0x20   : > { %4406 = vmatpush3.bf16.msra.mxu0 %v5058_v14  ;;  %4730 = vmatpush3.bf16.msra.mxu1 %v5057_v13  ;;  %v5081_v60 = vld [vmem:[%s6344_s1 + $0xa0] sm:$0xff]   ;;  %v4335_v61 = vpack.c.bf16 %v3807_v58, %v3806_v57  ;;  %v5084_v2 = vld [vmem:[%s6344_s1 + $0xa8] sm:$0xff]   ;;  %v5569_v6 = vpack.c.bf16 %v3817_v0, %v3816_v63  ;;  %v5086_v12 = vld [vmem:[%s6344_s1 + $0x70] sm:$0xff]   ;;  %s3777_s15 = sshll.u32 %s242_s14, 5  ;;  %s6302_s26 = scalar_lea.sflag [#allocation5], %s242_s14 }
  0x21   : > { %4407 = vmatprep.subr.bf16.mxu0 %v5059_v15  ;;  %4731 = vmatprep.subr.bf16.mxu1 %v5060_v16  ;;  %v5082_v62 = vld [vmem:[%s6344_s1 + $0x20] sm:$0xff]   ;;  %v3823_v4 = vld [vmem:[%s5472_s28 + $0x10a] ss:$2 sm:$0xff]  ;;  %v3789_v39 = vld [vmem:[%s5472_s28 + $0x91] ss:$2 sm:$0xff]  ;;  %s6285_s16 = scalar_lea.vmem [#allocation4], %s3777_s15 }
  0x22   : > { %v3822_v3 = vld [vmem:[%s5472_s28 + $0xda] ss:$2 sm:$0xff]  ;;  %v3825_v11 = vld [vmem:[%s5472_s28 + $0x16a] ss:$2 sm:$0xff]  ;;  %v3793_v63 = vld [vmem:[%s5472_s28 + $0x151] ss:$2 sm:$0xff] }
  0x23   : > { %v5085_v5 = vld [vmem:[%s6344_s1 + $0x28] sm:$0xff]   ;;  %v3808_v7 = vld [vmem:[%s5472_s28 + $0x138] ss:$2 sm:$0xff]  ;;  %v4337_v8 = vpack.c.bf16 %v3823_v4, %v3822_v3  ;;  %v5087_v14 = vld [vmem:[%s6344_s1 + $0xb0] sm:$0xff]   ;;  %s3665_s17 = sshll.u32 %s6285_s16, 4  ;;  %s6291_s17 = int_to_ptr.vmem [resolvable:$true] %s3665_s17 }
  0x24   : > { %4408 = vmatpush3.bf16.msra.mxu0 %v5061_v17  ;;  %4732 = vmatpush3.bf16.msra.mxu1 %v5060_v16  ;;  %v3809_v9 = vld [vmem:[%s5472_s28 + $0x168] ss:$2 sm:$0xff]  ;;  %v5089_v17 = vld [vmem:[%s6344_s1 + $0x78] sm:$0xff]   ;;  %v5092_v29 = vld [vmem:[%s6344_s1 + $0x1c0] sm:$0xff]   ;;  %s5256_s25 = scalar_lea.vmem %s6291_s17, 512  ;;  %p5263_p0 = scmp.lt.s32.totalorder %s6291_s17, %s5261_s9 }
  0x25   : > { %4409 = vmatprep.subr.bf16.mxu0 %v5062_v18  ;;  %4733 = vmatprep.subr.bf16.mxu1 %v5063_v19  ;;  %v3824_v10 = vld [vmem:[%s5472_s28 + $0x13a] ss:$2 sm:$0xff]  ;;  %v4338_v15 = vpack.c.bf16 %v3809_v9, %v3808_v7  ;;  %v5088_v16 = vld [vmem:[%s6344_s1 + $0x30] sm:$0xff]   ;;  %v3786_v18 = vld [vmem:[%s5472_s28 + $0x1] ss:$2 sm:$0xff]  ;;  %p5257_p11 = scmp.ne.s32.totalorder %s6291_s17, %s5256_s25  ;;  %p5264_p1 = scmp.lt.s32.totalorder %s5262_s10, %s5256_s25 }
  0x26   : > { %v4340_v13 = vpack.c.bf16 %v3825_v11, %v3824_v10  ;;  %v3795_v22 = vld [vmem:[%s5472_s28 + $0x32] ss:$2 sm:$0xff]  ;;  %v3796_v30 = vld [vmem:[%s5472_s28 + $0x62] ss:$2 sm:$0xff]  ;;  %vm5743_vm4 = vmand %vm258_vm0, %vm291_vm3 }
  0x27   : > { %v5091_v23 = vld [vmem:[%s6344_s1 + $0x38] sm:$0xff]   ;;  %v323_v26 = vld [vmem:[%s5472_s28] ss:$2 sm:$0xff]  ;;  %v5098_v45 = vld [vmem:[%s6344_s1 + $0x1d0] sm:$0xff]   ;;  %p5258_p12 = pnand %p5257_p11, %p5397_p5  ;;  %p5265_p2 = por %p5264_p1, %p5263_p0 }
  0x28   : > { %4410 = vmatpush3.bf16.msra.mxu0 %v5064_v20  ;;  %4734 = vmatpush3.bf16.msra.mxu1 %v5063_v19  ;;  %v3787_v19 = vld [vmem:[%s5472_s28 + $0x31] ss:$2 sm:$0xff]  ;;  %v3779_v27 = vld [vmem:[%s5472_s28 + $0x30] ss:$2 sm:$0xff]  ;;  %v3780_v42 = vld [vmem:[%s5472_s28 + $0x60] ss:$2 sm:$0xff] }
  0x29   : > { %4411 = vmatprep.subr.bf16.mxu0 %v5065_v21  ;;  %4735 = vmatprep.subr.bf16.mxu1 %v5066_v24  ;;  %v5090_v20 = vld [vmem:[%s6344_s1 + $0xb8] sm:$0xff]   ;;  %v3794_v21 = vld [vmem:[%s5472_s28 + $0x2] ss:$2 sm:$0xff]  ;;  %v4341_v33 = vpack.c.bf16 %v3779_v27, %v323_v26  ;;  %vm5893_vm6 = vmand %vm1857_vm5, %vm291_vm3  ;;  %p5259_p13 = pneg %p5258_p12 }
  0x2a   : > { %v3797_v31 = vld [vmem:[%s5472_s28 + $0x92] ss:$2 sm:$0xff]  ;;  %v5107_v0 = vld [vmem:[%s6344_s1 + $0x1e8] sm:$0xff]  }
  0x2b   : > { %v4346_v34 = vpack.c.bf16 %v3797_v31, %v3796_v30  ;;  %v5099_v46 = vld [vmem:[%s6344_s1 + $0x210] sm:$0xff]   ;;  %v5102_v52 = vld [vmem:[%s6344_s1 + $0x218] sm:$0xff]   ;;  %v5104_v58 = vld [vmem:[%s6344_s1 + $0x1e0] sm:$0xff]   ;;  %p5266_p3 = pnand %p5265_p2, %p5259_p13 }
  0x2c   : > { %4412 = vmatpush3.bf16.msra.mxu0 %v5067_v28  ;;  %4736 = vmatpush3.bf16.msra.mxu1 %v5066_v24  ;;  %v4342_v24 = vpack.c.bf16 %v3787_v19, %v3786_v18  ;;  %v4343_v28 = vpack.c.bf16 %v3795_v22, %v3794_v21  ;;  %v5103_v53 = vld [vmem:[%s6344_s1 + $0x198] sm:$0xff]   ;;  %v5108_v3 = vld [vmem:[%s6344_s1 + $0x228] sm:$0xff]  }
  0x2d   : > { %4449 = vmatprep.subr.bf16.mxu0 %v5068_v32  ;;  %4745 = vmatprep.subr.bf16.mxu1 %v5069_v35  ;;  %v5093_v32 = vld [vmem:[%s6344_s1 + $0x200] sm:$0xff]   ;;  %v3783_v57 = vld [vmem:[%s5472_s28 + $0xf0] ss:$2 sm:$0xff]  ;;  %v3956_v31 = vld [vmem:[%s5472_s28 + $0x91] ss:$2 sm:$0xff] }
  0x2e   : > { %v3801_v7 = vld [vmem:[%s5472_s28 + $0x152] ss:$2 sm:$0xff]  ;;  %v3955_v18 = vld [vmem:[%s5472_s28 + $0x61] ss:$2 sm:$0xff]  ;;  %v3963_v22 = vld [vmem:[%s5472_s28 + $0x62] ss:$2 sm:$0xff] }
  0x2f   : > { %860 = vmatmul.mubr.bf16.vlgmr.msra.gmra.mrb[0].mxu0 %v4329_v36  ;;  %4738 = vmatmul.mubr.bf16.vlgmr.msra.gmra.mrb[0].mxu1 %v4334_v37  ;;  %v3788_v36 = vld [vmem:[%s5472_s28 + $0x61] ss:$2 sm:$0xff]  ;;  %v3784_v10 = vld [vmem:[%s5472_s28 + $0x120] ss:$2 sm:$0xff]  ;;  %v5114_v21 = vld [vmem:[%s6344_s1 + $0x238] sm:$0xff]  }
  0x30   : > { %4450 = vmatpush3.bf16.msra.mxu0 %v5070_v38  ;;  %4746 = vmatpush3.bf16.msra.mxu1 %v5069_v35  ;;  %v5094_v35 = vld [vmem:[%s6344_s1 + $0x180] sm:$0xff]   ;;  %v5095_v37 = vld [vmem:[%s6344_s1 + $0x1c8] sm:$0xff]   ;;  %v5115_v26 = vld [vmem:[%s6344_s1 + $0x1b8] sm:$0xff]  }
  0x31   : > { %4451 = vmatprep.subr.bf16.mxu0 %v5071_v40  ;;  %4747 = vmatprep.subr.bf16.mxu1 %v5072_v41  ;;  %v5096_v38 = vld [vmem:[%s6344_s1 + $0x208] sm:$0xff]   ;;  %v3962_v19 = vld [vmem:[%s5472_s28 + $0x32] ss:$2 sm:$0xff] }
  0x32   : > { %867 = vmatprep.mubr.bf16.mxu0 %v5517_v44  ;;  %4741 = vmatprep.mubr.bf16.mxu1 %v4337_v8  ;;  %v5097_v40 = vld [vmem:[%s6344_s1 + $0x188] sm:$0xff]   ;;  %v3946_v27 = vld [vmem:[%s5472_s28 + $0x30] ss:$2 sm:$0xff] }
  0x33   : > { %v5109_v8 = vld [vmem:[%s6344_s1 + $0x1a8] sm:$0xff]  }
  0x34   : > { %4452 = vmatpush3.bf16.msra.mxu0 %v5073_v43  ;;  %4748 = vmatpush3.bf16.msra.mxu1 %v5072_v41  ;;  %v4345_v41 = vpack.c.bf16 %v3789_v39, %v3788_v36  ;;  %v3781_v43 = vld [vmem:[%s5472_s28 + $0x90] ss:$2 sm:$0xff] }
  0x35   : > { %4453 = vmatprep.subr.bf16.mxu0 %v5074_v47  ;;  %4749 = vmatprep.subr.bf16.mxu1 %v5075_v48  ;;  %v4344_v47 = vpack.c.bf16 %v3781_v43, %v3780_v42  ;;  %v3965_v30 = vld [vmem:[%s5472_s28 + $0xc2] ss:$2 sm:$0xff]  ;;  %v3958_v43 = vld [vmem:[%s5472_s28 + $0xf1] ss:$2 sm:$0xff] }
  0x36   : > { %v3948_v39 = vld [vmem:[%s5472_s28 + $0x90] ss:$2 sm:$0xff] }
  0x37   : > { %868 = vmatmul.mubr.bf16.gmra.mrb[4].mxu0 %v4332_v49  ;;  %4742 = vmatmul.mubr.bf16.gmra.mrb[4].mxu1 %v4340_v13  ;;  %v5101_v49 = vld [vmem:[%s6344_s1 + $0x1d8] sm:$0xff]   ;;  %v5110_v13 = vld [vmem:[%s6344_s1 + $0x1f0] sm:$0xff]  }
  0x38   : > { %4454 = vmatpush3.bf16.msra.mxu0 %v5076_v50  ;;  %4750 = vmatpush3.bf16.msra.mxu1 %v5075_v48  ;;  %v5100_v48 = vld [vmem:[%s6344_s1 + $0x190] sm:$0xff]   ;;  %v3790_v50 = vld [vmem:[%s5472_s28 + $0xc1] ss:$2 sm:$0xff] }
  0x39   : > { %4455 = vmatprep.subr.bf16.mxu0 %v5077_v51  ;;  %4751 = vmatprep.subr.bf16.mxu1 %v5078_v54  ;;  %v3791_v51 = vld [vmem:[%s5472_s28 + $0xf1] ss:$2 sm:$0xff]  ;;  %v3969_v42 = vld [vmem:[%s5472_s28 + $0x182] ss:$2 sm:$0xff] }
  0x3a   : > { %875 = vmatprep.mubr.bf16.mxu0 %v5542_v56  ;;  %4761 = vmatprep.mubr.bf16.mxu1 %v4343_v28  ;;  %v3947_v28 = vld [vmem:[%s5472_s28 + $0x60] ss:$2 sm:$0xff] }
  0x3c   : > { %4456 = vmatpush3.bf16.msra.mxu0 %v5079_v55  ;;  %4752 = vmatpush3.bf16.msra.mxu1 %v5078_v54  ;;  %v4348_v54 = vpack.c.bf16 %v3791_v51, %v3790_v50  ;;  %v3782_v55 = vld [vmem:[%s5472_s28 + $0xc0] ss:$2 sm:$0xff]  ;;  %v3960_v51 = vld [vmem:[%s5472_s28 + $0x151] ss:$2 sm:$0xff] }
  0x3d   : > { %4457 = vmatprep.subr.bf16.mxu0 %v5080_v59  ;;  %4753 = vmatprep.subr.bf16.mxu1 %v5081_v60  ;;  %v5105_v59 = vld [vmem:[%s6344_s1 + $0x220] sm:$0xff]  }
  0x3e   : > { %v3951_v50 = vld [vmem:[%s5472_s28 + $0x120] ss:$2 sm:$0xff] }
  0x3f   : > { %876 = vmatmul.mubr.bf16.gmra.mrb[8].mxu0 %v4335_v61  ;;  %v5106_v61 = vld [vmem:[%s6344_s1 + $0x1a0] sm:$0xff]  }
  0x40   : > { %4458 = vmatpush3.bf16.msra.mxu0 %v5082_v62  ;;  %4754 = vmatpush3.bf16.msra.mxu1 %v5081_v60  ;;  %v4347_v60 = vpack.c.bf16 %v3783_v57, %v3782_v55  ;;  %v3792_v62 = vld [vmem:[%s5472_s28 + $0x121] ss:$2 sm:$0xff]  ;;  %v3952_v55 = vld [vmem:[%s5472_s28 + $0x150] ss:$2 sm:$0xff]  ;;  %v3953_v57 = vld [vmem:[%s5472_s28 + $0x180] ss:$2 sm:$0xff] }
  0x41   : > { %4459 = vmatprep.subr.bf16.mxu0 %v5083_v1  ;;  %4755 = vmatprep.subr.bf16.mxu1 %v5084_v2  ;;  %v3798_v1 = vld [vmem:[%s5472_s28 + $0xc2] ss:$2 sm:$0xff]  ;;  %v4351_v9 = vpack.c.bf16 %v3793_v63, %v3792_v62 }
  0x42   : > { %883 = vmatprep.mubr.bf16.mxu0 %v5569_v6  ;;  %v5120_v62 = vld [vmem:[%s6348_s5 + $0x20] sm:$0xff]   ;;  %v5121_v63 = vld [vmem:[%s6348_s5 + $0x28] sm:$0xff]  }
  0x44   : > { %4460 = vmatpush3.bf16.msra.mxu0 %v5085_v5  ;;  %4756 = vmatpush3.bf16.msra.mxu1 %v5084_v2  ;;  %v3799_v2 = vld [vmem:[%s5472_s28 + $0xf2] ss:$2 sm:$0xff]  ;;  %v3800_v5 = vld [vmem:[%s5472_s28 + $0x122] ss:$2 sm:$0xff] }
  0x45   : > { %4461 = vmatprep.subr.bf16.mxu0 %v5086_v12  ;;  %4757 = vmatprep.subr.bf16.mxu1 %v5087_v14  ;;  %v4349_v4 = vpack.c.bf16 %v3799_v2, %v3798_v1  ;;  %v4352_v11 = vpack.c.bf16 %v3801_v7, %v3800_v5  ;;  %v3785_v12 = vld [vmem:[%s5472_s28 + $0x150] ss:$2 sm:$0xff]  ;;  %v264_v2 = vld [vmem:[#allocation2 + $0x8] sm:$0x1] }
  0x46   : > { %v5159_v1 = vld [vmem:[%s6346_s3 + $0x8] sm:$0xff]  }
  0x47   : > { %884 = vmatmul.mubr.bf16.gmra.mrb[12].mxu0 %v4338_v15  ;;  %v4350_v15 = vpack.c.bf16 %v3785_v12, %v3784_v10  ;;  %v5125_v10 = vld [vmem:[%s6346_s3 + $0xc0] sm:$0xff]   ;;  %v267_v12 = vld [vmem:[#allocation2 + $0x10] sm:$0x1] }
  0x48   : > { %4462 = vmatpush3.bf16.msra.mxu0 %v5088_v16  ;;  %4758 = vmatpush3.bf16.msra.mxu1 %v5087_v14  ;;  %v5111_v14 = vld [vmem:[%s6344_s1 + $0x230] sm:$0xff]  }
  0x49   : > { %4463 = vmatprep.subr.bf16.mxu0 %v5089_v17  ;;  %4759 = vmatprep.subr.bf16.mxu1 %v5090_v20  ;;  %v5112_v16 = vld [vmem:[%s6344_s1 + $0x1b0] sm:$0xff]  }
  0x4a   : > { %1157 = vmatprep.mubr.bf16.mxu0 %v4342_v24  ;;  %v3954_v17 = vld [vmem:[%s5472_s28 + $0x31] ss:$2 sm:$0xff]  ;;  %v4355_v24 = vpack.c.bf16 %v3963_v22, %v3962_v19 }
  0x4b   : > { %v5131_v22 = vld [vmem:[%s6346_s3 + $0xd0] sm:$0xff]  }
  0x4c   : > { %4464 = vmatpush3.bf16.msra.mxu0 %v5091_v23  ;;  %4760 = vmatpush3.bf16.msra.mxu1 %v5090_v20  ;;  %v5113_v20 = vld [vmem:[%s6344_s1 + $0x1f8] sm:$0xff]   ;;  %v4354_v23 = vpack.c.bf16 %v3955_v18, %v3954_v17  ;;  %v5129_v17 = vld [vmem:[%s6346_s3 + $0x148] sm:$0xff]  }
  0x4d   : > { %4501 = vmatprep.subr.bf16.mxu0 %v5092_v29  ;;  %4769 = vmatprep.subr.bf16.mxu1 %v5093_v32  ;;  %v3964_v29 = vld [vmem:[%s5472_s28 + $0x92] ss:$2 sm:$0xff] }
  0x4e   : > { %v4358_v36 = vpack.c.bf16 %v3965_v30, %v3964_v29  ;;  %v270_v18 = vld [vmem:[#allocation2 + $0x18] sm:$0x1] }
  0x4f   : > { %1158 = vmatmul.mubr.bf16.vlgmr.msra.gmra.mrb[16].mxu0 %v4341_v33  ;;  %4762 = vmatmul.mubr.bf16.vlgmr.msra.gmra.mrb[0].mxu1 %v4346_v34  ;;  %v3966_v33 = vld [vmem:[%s5472_s28 + $0xf2] ss:$2 sm:$0xff]  ;;  %v3967_v34 = vld [vmem:[%s5472_s28 + $0x122] ss:$2 sm:$0xff]  ;;  %v271_v19 = vsel %vm5736_vm2, 0, %v270_v18 }
  0x50   : > { %4502 = vmatpush3.bf16.msra.mxu0 %v5094_v35  ;;  %4770 = vmatpush3.bf16.msra.mxu1 %v5093_v32  ;;  %v3957_v32 = vld [vmem:[%s5472_s28 + $0xc1] ss:$2 sm:$0xff]  ;;  %v4353_v35 = vpack.c.bf16 %v3947_v28, %v3946_v27  ;;  %272 = vst [vmem:[#allocation2 + $0x18] sm:$0x1] %v271_v19  ;;  %v305_v28 = vld [vmem:[#allocation2 + $0x24] sm:$0x1] }
  0x51   : > { %4503 = vmatprep.subr.bf16.mxu0 %v5095_v37  ;;  %4771 = vmatprep.subr.bf16.mxu1 %v5096_v38  ;;  %v4357_v37 = vpack.c.bf16 %v3957_v32, %v3956_v31  ;;  %v5133_v29 = vld [vmem:[%s6346_s3 + $0x118] sm:$0xff]   ;;  %v5136_v32 = vld [vmem:[%s6346_s3 + $0x120] sm:$0xff]  }
  0x52   : > { %1165 = vmatprep.mubr.bf16.mxu0 %v4345_v41  ;;  %4765 = vmatprep.mubr.bf16.mxu1 %v4349_v4  ;;  %v3968_v41 = vld [vmem:[%s5472_s28 + $0x152] ss:$2 sm:$0xff]  ;;  %v265_v4 = vsel %vm5736_vm2, 0, %v264_v2 }
  0x53   : > { %266 = vst [vmem:[#allocation2 + $0x8] sm:$0x1] %v265_v4  ;;  %v5134_v30 = vld [vmem:[%s6346_s3 + $0xd8] sm:$0xff]   ;;  %v5153_v2 = vld [vmem:[%s6346_s3 + $0x40] sm:$0xff]  }
  0x54   : > { %4504 = vmatpush3.bf16.msra.mxu0 %v5097_v40  ;;  %4772 = vmatpush3.bf16.msra.mxu1 %v5096_v38  ;;  %v4361_v38 = vpack.c.bf16 %v3967_v34, %v3966_v33  ;;  %v3949_v40 = vld [vmem:[%s5472_s28 + $0xc0] ss:$2 sm:$0xff]  ;;  %v5135_v31 = vld [vmem:[%s6346_s3 + $0x158] sm:$0xff]  }
  0x55   : > { %4505 = vmatprep.subr.bf16.mxu0 %v5098_v45  ;;  %4773 = vmatprep.subr.bf16.mxu1 %v5099_v46  ;;  %v3959_v45 = vld [vmem:[%s5472_s28 + $0x121] ss:$2 sm:$0xff]  ;;  %v276_v33 = vld [vmem:[#allocation2 + $0x28] sm:$0x1]  ;;  %v308_v34 = vld [vmem:[#allocation2 + $0x2c] sm:$0x1] }
  0x57   : > { %1166 = vmatmul.mubr.bf16.gmra.mrb[20].mxu0 %v4344_v47  ;;  %4766 = vmatmul.mubr.bf16.gmra.mrb[4].mxu1 %v4352_v11  ;;  %v4364_v47 = vpack.c.bf16 %v3969_v42, %v3968_v41  ;;  %v5126_v11 = vld [vmem:[%s6346_s3 + $0x140] sm:$0xff]   ;;  %v279_v41 = vld [vmem:[#allocation2 + $0x30] sm:$0x1]  ;;  %v311_v42 = vld [vmem:[#allocation2 + $0x34] sm:$0x1] }
  0x58   : > { %4506 = vmatpush3.bf16.msra.mxu0 %v5100_v48  ;;  %4774 = vmatpush3.bf16.msra.mxu1 %v5099_v46  ;;  %v4356_v46 = vpack.c.bf16 %v3949_v40, %v3948_v39  ;;  %v4360_v48 = vpack.c.bf16 %v3959_v45, %v3958_v43  ;;  %v280_v43 = vsel %vm5736_vm2, 0, %v279_v41  ;;  %v312_v45 = vsel %vm5743_vm4, 0, %v311_v42 }
  0x59   : > { %4507 = vmatprep.subr.bf16.mxu0 %v5101_v49  ;;  %4775 = vmatprep.subr.bf16.mxu1 %v5102_v52  ;;  %v3950_v49 = vld [vmem:[%s5472_s28 + $0xf0] ss:$2 sm:$0xff]  ;;  %281 = vst [vmem:[#allocation2 + $0x30] sm:$0x1] %v280_v43  ;;  %313 = vst [vmem:[#allocation2 + $0x34] sm:$0x1] %v312_v45 }
  0x5a   : > { %1173 = vmatprep.mubr.bf16.mxu0 %v4348_v54  ;;  %4785 = vmatprep.mubr.bf16.mxu1 %v4355_v24  ;;  %v5320_v24 = vmov 0  }
  0x5b   : > { %253 = vst [vmem:[#allocation2] sm:$0xf] %v5320_v24  ;;  %254 = vst [vmem:[#allocation2 + $0x4] sm:$0x1] %v5320_v24 }
  0x5c   : > { %4508 = vmatpush3.bf16.msra.mxu0 %v5103_v53  ;;  %4776 = vmatpush3.bf16.msra.mxu1 %v5102_v52  ;;  %v3961_v52 = vld [vmem:[%s5472_s28 + $0x181] ss:$2 sm:$0xff]  ;;  %v4359_v53 = vpack.c.bf16 %v3951_v50, %v3950_v49  ;;  %256 = vst [vmem:[#allocation2 + $0x48] sm:$0xf] %v5320_v24  ;;  %257 = vst [vmem:[#allocation2 + $0x4c] sm:$0x1] %v5320_v24 }
  0x5d   : > { %4509 = vmatprep.subr.bf16.mxu0 %v5104_v58  ;;  %4777 = vmatprep.subr.bf16.mxu1 %v5105_v59  ;;  %v4363_v54 = vpack.c.bf16 %v3961_v52, %v3960_v51  ;;  %v4362_v58 = vpack.c.bf16 %v3953_v57, %v3952_v55  ;;  %v5142_v51 = vld [vmem:[%s6346_s3 + $0x130] sm:$0xff]  }
  0x5e   : > { %v5143_v52 = vld [vmem:[%s6346_s3 + $0xf0] sm:$0xff]  }
  0x5f   : > { %1174 = vmatmul.mubr.bf16.gmra.mrb[24].mxu0 %v4347_v60  ;;  %v5117_v60 = vld [vmem:[%s6348_s5 + $0x8] sm:$0xff]  }
  0x60   : > { %4510 = vmatpush3.bf16.msra.mxu0 %v5106_v61  ;;  %4778 = vmatpush3.bf16.msra.mxu1 %v5105_v59  ;;  %v5116_v59 = vld [vmem:[%s6348_s5] sm:$0xff]   ;;  %v5118_v61 = vld [vmem:[%s6348_s5 + $0x10] sm:$0xff]  }
  0x61   : > { %4511 = vmatprep.subr.bf16.mxu0 %v5107_v0  ;;  %4779 = vmatprep.subr.bf16.mxu1 %v5108_v3  ;;  %v5122_v0 = vld [vmem:[%s6348_s5 + $0x30] sm:$0xff]  }
  0x62   : > { %1181 = vmatprep.mubr.bf16.mxu0 %v4351_v9  ;;  %v5124_v9 = vld [vmem:[%s6346_s3 + $0x100] sm:$0xff]  }
  0x63   : > { %v261_v39 = vld [vmem:[#allocation2] sm:$0x1]  ;;  %v293_v40 = vld [vmem:[#allocation2 + $0x4] sm:$0x1] }
  0x64   : > { %4512 = vmatpush3.bf16.msra.mxu0 %v5109_v8  ;;  %4780 = vmatpush3.bf16.msra.mxu1 %v5108_v3  ;;  %v296_v3 = vld [vmem:[#allocation2 + $0xc] sm:$0x1]  ;;  %v5123_v8 = vld [vmem:[%s6348_s5 + $0x38] sm:$0xff]   ;;  %v262_v49 = vsel %vm5736_vm2, 0, %v261_v39  ;;  %v294_v50 = vsel %vm5743_vm4, 0, %v293_v40 }
  0x65   : > { %4513 = vmatprep.subr.bf16.mxu0 %v5110_v13  ;;  %4781 = vmatprep.subr.bf16.mxu1 %v5111_v14  ;;  %v297_v7 = vsel %vm5743_vm4, 0, %v296_v3  ;;  %v299_v13 = vld [vmem:[#allocation2 + $0x14] sm:$0x1]  ;;  %263 = vst [vmem:[#allocation2] sm:$0x1] %v262_v49  ;;  %v5865_v3 = vld [vmem:[%s6346_s3 + $0x80] sm:$0xff]  }
  0x66   : > { %298 = vst [vmem:[#allocation2 + $0xc] sm:$0x1] %v297_v7  ;;  %295 = vst [vmem:[#allocation2 + $0x4] sm:$0x1] %v294_v50 }
  0x67   : > { %1182 = vmatmul.mubr.bf16.gmra.mrb[28].mxu0 %v4350_v15  ;;  %v300_v15 = vsel %vm5743_vm4, 0, %v299_v13 }
  0x68   : > { %4514 = vmatpush3.bf16.msra.mxu0 %v5112_v16  ;;  %4782 = vmatpush3.bf16.msra.mxu1 %v5111_v14  ;;  %v268_v14 = vsel %vm5736_vm2, 0, %v267_v12  ;;  %v5127_v16 = vld [vmem:[%s6346_s3 + $0x108] sm:$0xff]   ;;  %301 = vst [vmem:[#allocation2 + $0x14] sm:$0x1] %v300_v15 }
  0x69   : > { %4515 = vmatprep.subr.bf16.mxu0 %v5113_v20  ;;  %4783 = vmatprep.subr.bf16.mxu1 %v5114_v21  ;;  %269 = vst [vmem:[#allocation2 + $0x10] sm:$0x1] %v268_v14  ;;  %v302_v20 = vld [vmem:[#allocation2 + $0x1c] sm:$0x1] }
  0x6a   : > { %1624 = vmatprep.mubr.bf16.mxu0 %v4354_v23  ;;  %v5132_v23 = vld [vmem:[%s6346_s3 + $0x150] sm:$0xff]  }
  0x6c   : > { %4516 = vmatpush3.bf16.msra.mxu0 %v5115_v26  ;;  %4784 = vmatpush3.bf16.msra.mxu1 %v5114_v21  ;;  %v303_v21 = vsel %vm5743_vm4, 0, %v302_v20  ;;  %v273_v26 = vld [vmem:[#allocation2 + $0x20] sm:$0x1] }
  0x6d   : > { %4793 = vmatprep.subr.bf16.mxu0 %v5116_v59  ;;  %4565 = vmatprep.subr.bf16.mxu1 %v5124_v9  ;;  %304 = vst [vmem:[#allocation2 + $0x1c] sm:$0x1] %v303_v21  ;;  %v274_v27 = vsel %vm5736_vm2, 0, %v273_v26 }
  0x6e   : > { %275 = vst [vmem:[#allocation2 + $0x20] sm:$0x1] %v274_v27 }
  0x6f   : > { %1625 = vmatmul.mubr.bf16.vlgmr.msra.gmra.mrb[32].mxu0 %v4353_v35  ;;  %4786 = vmatmul.mubr.bf16.vlgmr.msra.gmra.mrb[0].mxu1 %v4358_v36  ;;  %v277_v35 = vsel %vm5736_vm2, 0, %v276_v33  ;;  %v309_v36 = vsel %vm5743_vm4, 0, %v308_v34 }
  0x70   : > { %1632 = vmatprep.mubr.bf16.mxu0 %v4357_v37  ;;  %4789 = vmatprep.mubr.bf16.mxu1 %v4361_v38  ;;  %v5137_v37 = vld [vmem:[%s6346_s3 + $0xe0] sm:$0xff]   ;;  %278 = vst [vmem:[#allocation2 + $0x28] sm:$0x1] %v277_v35  ;;  %310 = vst [vmem:[#allocation2 + $0x2c] sm:$0x1] %v309_v36 }
  0x71   : > { %4794 = vmatpush3.bf16.msra.mxu0 %v5116_v59  ;;  %4566 = vmatpush3.bf16.msra.mxu1 %v5125_v10  ;;  %v5138_v38 = vld [vmem:[%s6346_s3 + $0x160] sm:$0xff]  }
  0x72   : > { %4795 = vmatprep.subr.bf16.mxu0 %v5117_v60  ;;  %4567 = vmatprep.subr.bf16.mxu1 %v5127_v16  ;;  %v285_v59 = vld [vmem:[#allocation2 + $0x40] sm:$0x1] }
  0x75   : > { %4796 = vmatpush3.bf16.msra.mxu0 %v5117_v60  ;;  %v317_v60 = vld [vmem:[#allocation2 + $0x44] sm:$0x1] }
  0x76   : > { %4797 = vmatprep.subr.bf16.mxu0 %v5118_v61 }
  0x77   : > { %1633 = vmatmul.mubr.bf16.gmra.mrb[36].mxu0 %v4356_v46  ;;  %4790 = vmatmul.mubr.bf16.gmra.mrb[4].mxu1 %v4364_v47  ;;  %v5139_v46 = vld [vmem:[%s6346_s3 + $0x128] sm:$0xff]  }
  0x78   : > { %1640 = vmatprep.mubr.bf16.mxu0 %v4360_v48  ;;  %v5140_v47 = vld [vmem:[%s6346_s3 + $0xe8] sm:$0xff]  }
  0x79   : > { %4798 = vmatpush3.bf16.msra.mxu0 %v5118_v61  ;;  %v5141_v48 = vld [vmem:[%s6346_s3 + $0x168] sm:$0xff]   ;;  %v286_v61 = vsel %vm5736_vm2, 0, %v285_v59 }
  0x7a   : > { %287 = vst [vmem:[#allocation2 + $0x40] sm:$0x1] %v286_v61 }
  0x7f   : > { %1641 = vmatmul.mubr.bf16.gmra.mrb[40].mxu0 %v4359_v53  ;;  %v282_v53 = vld [vmem:[#allocation2 + $0x38] sm:$0x1] }
  0x80   : > { %1648 = vmatprep.mubr.bf16.mxu0 %v4363_v54  ;;  %v314_v54 = vld [vmem:[#allocation2 + $0x3c] sm:$0x1]  ;;  %v283_v55 = vsel %vm5736_vm2, 0, %v282_v53 }
  0x81   : > { %v315_v57 = vsel %vm5743_vm4, 0, %v314_v54  ;;  %284 = vst [vmem:[#allocation2 + $0x38] sm:$0x1] %v283_v55 }
  0x82   : > { %316 = vst [vmem:[#allocation2 + $0x3c] sm:$0x1] %v315_v57 }
  0x87   : > { %1649 = vmatmul.mubr.bf16.gmra.mrb[44].mxu0 %v4362_v58  ;;  %v5144_v58 = vld [vmem:[%s6346_s3 + $0x170] sm:$0xff]  }
  0x88   : > { %4809 = vmatprep.mubr.bf16.mxu0 %v5485_v25  ;;  %v5119_v25 = vld [vmem:[%s6348_s5 + $0x18] sm:$0xff]  }
  0x89   : > { %4799 = vmatprep.subr.bf16.mxu0 %v5119_v25 }
  0x8a   : > { %4800 = vmatpush3.bf16.msra.mxu0 %v5119_v25  ;;  %v318_v25 = vsel %vm5743_vm4, 0, %v317_v60 }
  0x8b   : > { %4801 = vmatprep.subr.bf16.mxu0 %v5120_v62  ;;  %319 = vst [vmem:[#allocation2 + $0x44] sm:$0x1] %v318_v25 }
  0x8e   : > { %4802 = vmatpush3.bf16.msra.mxu0 %v5120_v62  ;;  %v5150_v62 = vld [vmem:[%s6346_s3 + $0x138] sm:$0xff]  }
  0x8f   : > { %4803 = vmatprep.subr.bf16.mxu0 %v5121_v63 }
  0x92   : > { %4804 = vmatpush3.bf16.msra.mxu0 %v5121_v63  ;;  %v5151_v63 = vld [vmem:[%s6346_s3 + $0xf8] sm:$0xff]  }
  0x93   : > { %4805 = vmatprep.subr.bf16.mxu0 %v5122_v0 }
  0x96   : > { %4806 = vmatpush3.bf16.msra.mxu0 %v5122_v0  ;;  %v5152_v0 = vld [vmem:[%s6346_s3 + $0x178] sm:$0xff]  }
  0x97   : > { %4807 = vmatprep.subr.bf16.mxu0 %v5123_v8 }
  0x9a   : > { %4808 = vmatpush3.bf16.msra.mxu0 %v5123_v8 }
  0x9b   : > { %4817 = vmatprep.subr.bf16.mxu0 %v5126_v11 }
  0x9d   : > { %4810 = vmatmul.mubr.bf16.vlgmr.msra.gmra.mrb[48].mxu0 %v5517_v44  ;;  %v5128_v44 = vld [vmem:[%s6346_s3 + $0xc8] sm:$0xff]  }
  0x9e   : > { %4813 = vmatprep.mubr.bf16.mxu0 %v5542_v56  ;;  %4818 = vmatpush3.bf16.msra.mxu0 %v5126_v11  ;;  %v5130_v56 = vld [vmem:[%s6346_s3 + $0x110] sm:$0xff]  }
  0x9f   : > { %4568 = vmatpush3.bf16.msra.mxu1 %v5128_v44  ;;  %4819 = vmatprep.subr.bf16.mxu0 %v5129_v17 }
  0xa0   : > { %4569 = vmatprep.subr.bf16.mxu1 %v5130_v56 }
  0xa2   : > { %4820 = vmatpush3.bf16.msra.mxu0 %v5129_v17 }
  0xa3   : > { %4570 = vmatpush3.bf16.msra.mxu1 %v5131_v22  ;;  %4821 = vmatprep.subr.bf16.mxu0 %v5132_v23  ;;  %v288_v22 = vld [vmem:[#allocation2 + $0x48] sm:$0x1] }
  0xa4   : > { %4571 = vmatprep.subr.bf16.mxu1 %v5133_v29  ;;  %v289_v24 = vsel %vm5736_vm2, 0, %v288_v22 }
  0xa5   : > { %4814 = vmatmul.mubr.bf16.gmra.mrb[52].mxu0 %v5569_v6  ;;  %v306_v6 = vsel %vm5743_vm4, 0, %v305_v28  ;;  %290 = vst [vmem:[#allocation2 + $0x48] sm:$0x1] %v289_v24 }
  0xa6   : > { %4822 = vmatpush3.bf16.msra.mxu0 %v5132_v23  ;;  %307 = vst [vmem:[#allocation2 + $0x24] sm:$0x1] %v306_v6  ;;  %v320_v23 = vld [vmem:[#allocation2 + $0x4c] sm:$0x1] }
  0xa7   : > { %4572 = vmatpush3.bf16.msra.mxu1 %v5134_v30  ;;  %4823 = vmatprep.subr.bf16.mxu0 %v5135_v31  ;;  %v321_v26 = vsel %vm5743_vm4, 0, %v320_v23 }
  0xa8   : > { %4573 = vmatprep.subr.bf16.mxu1 %v5136_v32  ;;  %322 = vst [vmem:[#allocation2 + $0x4c] sm:$0x1] %v321_v26 }
  0xaa   : > { %4824 = vmatpush3.bf16.msra.mxu0 %v5135_v31 }
  0xab   : > { %4574 = vmatpush3.bf16.msra.mxu1 %v5137_v37  ;;  %4825 = vmatprep.subr.bf16.mxu0 %v5138_v38 }
  0xac   : > { %4575 = vmatprep.subr.bf16.mxu1 %v5139_v46 }
  0xae   : > { %4826 = vmatpush3.bf16.msra.mxu0 %v5138_v38 }
  0xaf   : > { %4576 = vmatpush3.bf16.msra.mxu1 %v5140_v47  ;;  %4827 = vmatprep.subr.bf16.mxu0 %v5141_v48 }
  0xb0   : > { %4577 = vmatprep.subr.bf16.mxu1 %v5142_v51 }
  0xb2   : > { %4828 = vmatpush3.bf16.msra.mxu0 %v5141_v48 }
  0xb3   : > { %4578 = vmatpush3.bf16.msra.mxu1 %v5143_v52  ;;  %4829 = vmatprep.subr.bf16.mxu0 %v5144_v58 }
  0xb4   : > { %4579 = vmatprep.subr.bf16.mxu1 %v5150_v62 }
  0xb6   : > { %4830 = vmatpush3.bf16.msra.mxu0 %v5144_v58 }
  0xb7   : > { %4580 = vmatpush3.bf16.msra.mxu1 %v5151_v63  ;;  %4831 = vmatprep.subr.bf16.mxu0 %v5152_v0 }
  0xb8   : > { %4617 = vmatprep.subr.bf16.mxu1 %v5153_v2 }
  0xba   : > { %4832 = vmatpush3.bf16.msra.mxu0 %v5152_v0 }
  0xbb   : > { %4841 = vmatprep.subr.bf16.mxu0 %v5865_v3 }
 0x102   : > { %v4413_v4 = vpop.f32.mrb[0].mxu0 }
 0x103   : > { %v4414_v7 = vpop.f32.mrb[1].mxu0 }
 0x104   : > { %v4415_v8 = vadd.f32 %v4414_v7, %v4413_v4  ;;  %v4416_v9 = vpop.f32.mrb[2].mxu0 }
 0x105   : > { %v4417_v10 = vpop.f32.mrb[3].mxu0 }
 0x106   : > { %v4418_v11 = vadd.f32 %v4417_v10, %v4416_v9 }
 0x10a   : > { %v4419_v12 = vpop.f32.mrb[4].mxu0 }
 0x10b   : > { %v4420_v13 = vpop.f32.mrb[5].mxu0 }
 0x10c   : > { %v4421_v14 = vadd.f32 %v4420_v13, %v4419_v12  ;;  %v4422_v15 = vpop.f32.mrb[6].mxu0 }
 0x10d   : > { %v4423_v16 = vpop.f32.mrb[7].mxu0 }
 0x10e   : > { %v4424_v44 = vadd.f32 %v4423_v16, %v4422_v15  ;;  %v5883_v15 = vld [vmem:[%s6345_s2] ss:$0 sm:$0xff] }
 0x112   : > { %v4425_v17 = vpop.f32.mrb[8].mxu0 }
 0x113   : > { %v4426_v18 = vpop.f32.mrb[9].mxu0 }
 0x114   : > { %v4427_v56 = vadd.f32 %v4426_v18, %v4425_v17  ;;  %v4428_v19 = vpop.f32.mrb[10].mxu0 }
 0x115   : > { %v4429_v20 = vpop.f32.mrb[11].mxu0 }
 0x116   : > { %v4430_v21 = vadd.f32 %v4429_v20, %v4428_v19 }
 0x11a   : > { %v4431_v27 = vpop.f32.mrb[12].mxu0 }
 0x11b   : > { %v4432_v28 = vpop.f32.mrb[13].mxu0 }
 0x11c   : > { %v4433_v29 = vadd.f32 %v4432_v28, %v4431_v27  ;;  %v4434_v6 = vpop.f32.mrb[14].mxu0 }
 0x11d   : > { %v4435_v30 = vpop.f32.mrb[15].mxu0 }
 0x11e   : > { %v4436_v31 = vadd.f32 %v4435_v30, %v4434_v6 }
 0x122   : > { %v4465_v32 = vpop.f32.mrb[16].mxu0 }
 0x123   : > { %v4466_v33 = vpop.f32.mrb[17].mxu0 }
 0x124   : > { %v4467_v34 = vadd.f32 %v4466_v33, %v4465_v32  ;;  %v4468_v35 = vpop.f32.mrb[18].mxu0 }
 0x125   : > { %v4469_v36 = vpop.f32.mrb[19].mxu0 }
 0x126   : > { %v4908_v37 = vadd.f32 %v4467_v34, %v4415_v8  ;;  %v4470_v38 = vadd.f32 %v4469_v36, %v4468_v35 }
 0x128   : > { %v4914_v39 = vadd.f32 %v4470_v38, %v4418_v11 }
 0x12a   : > { %v4471_v40 = vpop.f32.mrb[20].mxu0 }
 0x12b   : > { %v4472_v41 = vpop.f32.mrb[21].mxu0 }
 0x12c   : > { %v4473_v5 = vadd.f32 %v4472_v41, %v4471_v40  ;;  %v4474_v42 = vpop.f32.mrb[22].mxu0 }
 0x12d   : > { %v4475_v43 = vpop.f32.mrb[23].mxu0 }
 0x12e   : > { %v4905_v45 = vadd.f32 %v4473_v5, %v4421_v14  ;;  %v4476_v46 = vadd.f32 %v4475_v43, %v4474_v42  ;;  %v1859_v42 = vld [vmem:[#allocation2 + $0x8] sm:$0xf]  ;;  %v1862_v43 = vld [vmem:[#allocation2 + $0xc] sm:$0x1] }
 0x130   : > { %v4911_v47 = vadd.f32 %v4476_v46, %v4424_v44 }
 0x132   : > { %v4477_v48 = vpop.f32.mrb[24].mxu0 }
 0x133   : > { %v4478_v49 = vpop.f32.mrb[25].mxu0 }
 0x134   : > { %v4479_v50 = vadd.f32 %v4478_v49, %v4477_v48  ;;  %v4480_v51 = vpop.f32.mrb[26].mxu0 }
 0x135   : > { %v4481_v52 = vpop.f32.mrb[27].mxu0 }
 0x136   : > { %v5872_v53 = vadd.f32 %v4479_v50, %v4427_v56  ;;  %v4482_v54 = vadd.f32 %v4481_v52, %v4480_v51 }
 0x138   : > { %v5874_v55 = vadd.f32 %v4482_v54, %v4430_v21  ;;  %v1865_v54 = vld [vmem:[#allocation2 + $0x10] sm:$0xf] }
 0x13a   : > { %v4483_v57 = vpop.f32.mrb[28].mxu0 }
 0x13b   : > { %v4484_v58 = vpop.f32.mrb[29].mxu0 }
 0x13c   : > { %v4485_v59 = vadd.f32 %v4484_v58, %v4483_v57  ;;  %v4486_v60 = vpop.f32.mrb[30].mxu0  ;;  %v1868_v57 = vld [vmem:[#allocation2 + $0x14] sm:$0x1] }
 0x13d   : > { %v4487_v61 = vpop.f32.mrb[31].mxu0 }
 0x13e   : > { %v5876_v25 = vadd.f32 %v4485_v59, %v4433_v29  ;;  %v4488_v62 = vadd.f32 %v4487_v61, %v4486_v60 }
 0x140   : > { %v5878_v63 = vadd.f32 %v4488_v62, %v4436_v31 }
 0x142   : > { %v4517_v0 = vpop.f32.mrb[32].mxu0  ;;  %v4787_v2 = vpop.f32.mrb[0].mxu1 }
 0x143   : > { %v4518_v4 = vpop.f32.mrb[33].mxu0  ;;  %v1691_v7 = vpop.f32.mrb[1].mxu1 }
 0x144   : > { %v4519_v8 = vadd.f32 %v4518_v4, %v4517_v0  ;;  %v4520_v9 = vpop.f32.mrb[34].mxu0  ;;  %v4788_v10 = vpop.f32.mrb[2].mxu1 }
 0x145   : > { %v4521_v11 = vpop.f32.mrb[35].mxu0  ;;  %v1694_v12 = vpop.f32.mrb[3].mxu1 }
 0x146   : > { %v4909_v13 = vadd.f32 %v4908_v37, %v4519_v8  ;;  %v4522_v14 = vadd.f32 %v4521_v11, %v4520_v9 }
 0x148   : > { %v4910_v16 = vadd.f32 %v4909_v13, %v1691_v7  ;;  %v4915_v44 = vadd.f32 %v4914_v39, %v4522_v14 }
 0x14a   : > { %v1736_v17 = vadd.f32 %v4910_v16, %v5883_v15  ;;  %v4916_v18 = vadd.f32 %v4915_v44, %v1694_v12  ;;  %v4523_v56 = vpop.f32.mrb[36].mxu0  ;;  %v5886_v19 = vpop.f32.mrb[4].mxu1 }
 0x14b   : > { %v4524_v20 = vpop.f32.mrb[37].mxu0  ;;  %v1707_v21 = vpop.f32.mrb[5].mxu1 }
 0x14c   : > { %v1744_v22 = vmax.f32 %v1736_v17, 0.0  ;;  %v1737_v23 = vadd.f32 %v4916_v18, %v5883_v15  ;;  %v4525_v24 = vadd.f32 %v4524_v20, %v4523_v56  ;;  %v4526_v26 = vpop.f32.mrb[38].mxu0  ;;  %v5889_v27 = vpop.f32.mrb[6].mxu1 }
 0x14d   : > { %v4527_v28 = vpop.f32.mrb[39].mxu0  ;;  %v1710_v29 = vpop.f32.mrb[7].mxu1 }
 0x14e   : > { %v4365_v6 = vpack.c.bf16 %v1744_v22, %v1744_v22  ;;  %v1745_v30 = vmax.f32 %v1737_v23, 0.0  ;;  %v4906_v31 = vadd.f32 %v4905_v45, %v4525_v24  ;;  %v4528_v32 = vadd.f32 %v4527_v28, %v4526_v26  ;;  %v1871_v22 = vld [vmem:[#allocation2 + $0x18] sm:$0xf]  ;;  %v1874_v23 = vld [vmem:[#allocation2 + $0x1c] sm:$0x1] }
 0x150   : > { %v1777_v33 = vshrl.u32 %v4365_v6, 16  ;;  %v4366_v34 = vpack.c.bf16 %v1745_v30, %v1745_v30  ;;  %v4907_v35 = vadd.f32 %v4906_v31, %v4787_v2  ;;  %v4912_v36 = vadd.f32 %v4911_v47, %v4528_v32 }
 0x151   : > { %v1780_v38 = vshll.u32 %v4365_v6, 16 }
 0x152   : > { %v1779_v37 = vrot.slane %v1777_v33, 7  ;;  %v1785_v39 = vshrl.u32 %v4366_v34, 16  ;;  %v1738_v40 = vadd.f32 %v4907_v35, %v5883_v15  ;;  %v4529_v41 = vpop.f32.mrb[40].mxu0  ;;  %v1788_v45 = vshll.u32 %v4366_v34, 16  ;;  %v1877_v33 = vld [vmem:[#allocation2 + $0x20] sm:$0xf] }
 0x153   : > { %v4913_v46 = vadd.f32 %v4912_v36, %v4788_v10  ;;  %v4530_v48 = vpop.f32.mrb[41].mxu0 }
 0x154   : > { %v1782_v49 = vor.u32 %v1780_v38, %v1779_v37  ;;  %v1783_v50 = vrot.slane %v1779_v37, 4  ;;  %v1787_v51 = vrot.slane %v1785_v39, 7  ;;  %v1746_v47 = vmax.f32 %v1738_v40, 0.0  ;;  %v4532_v52 = vpop.f32.mrb[42].mxu0 }
 0x155   : > { %v1739_v58 = vadd.f32 %v4913_v46, %v5883_v15  ;;  %v4531_v59 = vadd.f32 %v4530_v48, %v4529_v41  ;;  %v4533_v60 = vpop.f32.mrb[43].mxu0 }
 0x156   : > { %v1860_v61 = vsel %vm5893_vm6, %v1782_v49, %v1859_v42  ;;  %v1863_v62 = vsel %vm5736_vm2, %v1783_v50, %v1862_v43  ;;  %v1790_v0 = vor.u32 %v1788_v45, %v1787_v51  ;;  %v1791_v2 = vrot.slane %v1787_v51, 4 }
 0x157   : > { %1861 = vst [vmem:[#allocation2 + $0x8] sm:$0xf] %v1860_v61  ;;  %1864 = vst [vmem:[#allocation2 + $0xc] sm:$0x1] %v1863_v62  ;;  %v4367_v4 = vpack.c.bf16 %v1746_v47, %v1746_v47  ;;  %v1747_v7 = vmax.f32 %v1739_v58, 0.0  ;;  %v4921_v8 = vadd.f32 %v5872_v53, %v4531_v59  ;;  %v4534_v9 = vadd.f32 %v4533_v60, %v4532_v52 }
 0x158   : > { %v1866_v10 = vsel %vm5893_vm6, %v1790_v0, %v1865_v54  ;;  %v1869_v11 = vsel %vm5736_vm2, %v1791_v2, %v1868_v57  ;;  %v1883_v2 = vld [vmem:[#allocation2 + $0x28] sm:$0xf] }
 0x159   : > { %1867 = vst [vmem:[#allocation2 + $0x10] sm:$0xf] %v1866_v10  ;;  %1870 = vst [vmem:[#allocation2 + $0x14] sm:$0x1] %v1869_v11  ;;  %v1793_v12 = vshrl.u32 %v4367_v4, 16  ;;  %v4368_v13 = vpack.c.bf16 %v1747_v7, %v1747_v7  ;;  %v4922_v14 = vadd.f32 %v4921_v8, %v1707_v21  ;;  %v4927_v16 = vadd.f32 %v5874_v55, %v4534_v9 }
 0x15a   : > { %v4535_v44 = vpop.f32.mrb[44].mxu0  ;;  %v1796_v18 = vshll.u32 %v4367_v4, 16  ;;  %v1880_v55 = vld [vmem:[#allocation2 + $0x24] sm:$0x1]  ;;  %v1886_v9 = vld [vmem:[#allocation2 + $0x2c] sm:$0x1] }
 0x15b   : > { %v1795_v17 = vrot.slane %v1793_v12, 7  ;;  %v1801_v56 = vshrl.u32 %v4368_v13, 16  ;;  %v1740_v53 = vadd.f32 %v4922_v14, %v5883_v15  ;;  %v4536_v20 = vpop.f32.mrb[45].mxu0  ;;  %v1804_v24 = vshll.u32 %v4368_v13, 16 }
 0x15c   : > { %v4928_v26 = vadd.f32 %v4927_v16, %v1710_v29  ;;  %v4537_v28 = vadd.f32 %v4536_v20, %v4535_v44  ;;  %v4538_v6 = vpop.f32.mrb[46].mxu0 }
 0x15d   : > { %v1798_v30 = vor.u32 %v1796_v18, %v1795_v17  ;;  %v1799_v31 = vrot.slane %v1795_v17, 4  ;;  %v1803_v32 = vrot.slane %v1801_v56, 7  ;;  %v1748_v21 = vmax.f32 %v1740_v53, 0.0  ;;  %v4539_v34 = vpop.f32.mrb[47].mxu0  ;;  %v1889_v17 = vld [vmem:[#allocation2 + $0x30] sm:$0xf] }
 0x15e   : > { %v1741_v35 = vadd.f32 %v4928_v26, %v5883_v15  ;;  %v4918_v36 = vadd.f32 %v5876_v25, %v4537_v28  ;;  %v4540_v37 = vadd.f32 %v4539_v34, %v4538_v6  ;;  %v5911_v38 = vld [vmem:[#allocation2 + $0x8] sm:$0xf]  ;;  %v2268_v39 = vld [vmem:[#allocation2 + $0xc] sm:$0x1]  ;;  %v1892_v18 = vld [vmem:[#allocation2 + $0x34] sm:$0x1] }
 0x15f   : > { %v1872_v29 = vsel %vm5893_vm6, %v1798_v30, %v1871_v22  ;;  %v1875_v40 = vsel %vm5736_vm2, %v1799_v31, %v1874_v23  ;;  %v1806_v41 = vor.u32 %v1804_v24, %v1803_v32  ;;  %v1807_v42 = vrot.slane %v1803_v32, 4  ;;  %v2276_v43 = vld [vmem:[#allocation2 + $0x8] sm:$0xe] }
 0x160   : > { %1873 = vst [vmem:[#allocation2 + $0x18] sm:$0xf] %v1872_v29  ;;  %1876 = vst [vmem:[#allocation2 + $0x1c] sm:$0x1] %v1875_v40  ;;  %v4369_v45 = vpack.c.bf16 %v1748_v21, %v1748_v21  ;;  %v1749_v46 = vmax.f32 %v1741_v35, 0.0  ;;  %v4919_v48 = vadd.f32 %v4918_v36, %v5886_v19  ;;  %v4924_v25 = vadd.f32 %v5878_v63, %v4540_v37 }
 0x161   : > { %v5919_v49 = vld [vmem:[#allocation2 + $0x10] sm:$0xf]  ;;  %v2269_v50 = vld [vmem:[#allocation2 + $0x14] sm:$0x1]  ;;  %v1878_v51 = vsel %vm5893_vm6, %v1806_v41, %v1877_v33  ;;  %v1881_v47 = vsel %vm5736_vm2, %v1807_v42, %v1880_v55  ;;  %v4087_v54 = vcombine.low %v5911_v38, %v2268_v39  ;;  %v4095_v61 = vcombine.low %v2276_v43, %v2268_v39  ;;  %v1895_v43 = vld [vmem:[#allocation2 + $0x38] sm:$0xf] }
 0x162   : > { %v2277_v52 = vld [vmem:[#allocation2 + $0x10] sm:$0xe]  ;;  %1879 = vst [vmem:[#allocation2 + $0x20] sm:$0xf] %v1878_v51  ;;  %1882 = vst [vmem:[#allocation2 + $0x24] sm:$0x1] %v1881_v47  ;;  %v4370_v58 = vpack.c.bf16 %v1749_v46, %v1749_v46  ;;  %v1742_v19 = vadd.f32 %v4919_v48, %v5883_v15  ;;  %v5928_v63 = vcombine.low %v5919_v49, %v2269_v50 }
 0x163   : > { %v1809_v57 = vshrl.u32 %v4369_v45, 16  ;;  %v1812_v59 = vshll.u32 %v4369_v45, 16  ;;  %v4925_v60 = vadd.f32 %v4924_v25, %v5889_v27  ;;  %v4096_v62 = vcombine.low %v2277_v52, %v2269_v50  ;;  %v1898_v45 = vld [vmem:[#allocation2 + $0x3c] sm:$0x1] }
 0x164   : > { %v1817_v4 = vshrl.u32 %v4370_v58, 16  ;;  %v1820_v7 = vshll.u32 %v4370_v58, 16  ;;  %v1750_v8 = vmax.f32 %v1742_v19, 0.0  ;;  %v2404_v11 = vrot.slane %v4095_v61, 1  ;;  %v1904_v58 = vld [vmem:[#allocation2 + $0x44] sm:$0x1] }
 0x165   : > { %v1811_v0 = vrot.slane %v1809_v57, 7  ;;  %v1743_v10 = vadd.f32 %v4925_v60, %v5883_v15  ;;  %v2405_v12 = vrot.slane %v4096_v62, 1  ;;  %v2325_v13 = vshrl.u32 %v4087_v54, 16 }
 0x166   : > { %v1819_v44 = vrot.slane %v1817_v4, 7  ;;  %v4371_v56 = vpack.c.bf16 %v1750_v8, %v1750_v8  ;;  %v2327_v20 = vshll.u32 %v4087_v54, 16  ;;  %v2332_v22 = vshrl.u32 %v5928_v63, 16  ;;  %v1901_v54 = vld [vmem:[#allocation2 + $0x40] sm:$0xf] }
 0x167   : > { %v1814_v14 = vor.u32 %v1812_v59, %v1811_v0  ;;  %v1815_v16 = vrot.slane %v1811_v0, 4  ;;  %v1751_v27 = vmax.f32 %v1743_v10, 0.0  ;;  %v4153_v53 = vcombine.low %v2404_v11, %v2405_v12  ;;  %v2270_v23 = vld [vmem:[#allocation2 + $0x1c] sm:$0x1]  ;;  %v2278_v6 = vld [vmem:[#allocation2 + $0x18] sm:$0xe] }
 0x168   : > { %v1822_v26 = vor.u32 %v1820_v7, %v1819_v44  ;;  %v1823_v28 = vrot.slane %v1819_v44, 4  ;;  %v1825_v30 = vshrl.u32 %v4371_v56, 16  ;;  %v2329_v32 = vrot.slane %v2327_v20, 1  ;;  %v5937_v21 = vld [vmem:[#allocation2 + $0x18] sm:$0xf]  ;;  %v5154_v4 = vld [vmem:[%s6346_s3] sm:$0xff]  }
 0x169   : > { %v1884_v24 = vsel %vm5893_vm6, %v1814_v14, %v1883_v2  ;;  %v1887_v15 = vsel %vm5736_vm2, %v1815_v16, %v1886_v9  ;;  %v4372_v31 = vpack.c.bf16 %v1751_v27, %v1751_v27  ;;  %4833 = vmatprep.mubr.bf16.mxu0 %v4153_v53  ;;  %v2271_v33 = vld [vmem:[#allocation2 + $0x24] sm:$0x1]  ;;  %v2334_v35 = vshll.u32 %v5928_v63, 16  ;;  %v2279_v36 = vld [vmem:[#allocation2 + $0x20] sm:$0xe]  ;;  %v5160_v12 = vld [vmem:[%s6346_s3 + $0x88] sm:$0xff]  }
 0x16a   : > { %1885 = vst [vmem:[#allocation2 + $0x28] sm:$0xf] %v1884_v24  ;;  %1888 = vst [vmem:[#allocation2 + $0x2c] sm:$0x1] %v1887_v15  ;;  %v1890_v34 = vsel %vm5893_vm6, %v1822_v26, %v1889_v17  ;;  %v1893_v55 = vsel %vm5736_vm2, %v1823_v28, %v1892_v18  ;;  %v4097_v37 = vcombine.low %v2278_v6, %v2270_v23  ;;  %v5944_v39 = vld [vmem:[#allocation2 + $0x20] sm:$0xf] }
 0x16b   : > { %1891 = vst [vmem:[#allocation2 + $0x30] sm:$0xf] %v1890_v34  ;;  %1894 = vst [vmem:[#allocation2 + $0x34] sm:$0x1] %v1893_v55  ;;  %v1827_v29 = vrot.slane %v1825_v30, 7  ;;  %v1828_v40 = vshll.u32 %v4371_v56, 16  ;;  %v2330_v46 = vor.u32 %v2329_v32, %v2325_v13  ;;  %v4098_v25 = vcombine.low %v2279_v36, %v2271_v33 }
 0x16c   : > { %v1833_v41 = vshrl.u32 %v4372_v31, 16  ;;  %v1836_v42 = vshll.u32 %v4372_v31, 16  ;;  %v2336_v48 = vrot.slane %v2334_v35, 1  ;;  %v4089_v50 = vcombine.low %v5937_v21, %v2270_v23  ;;  %v5955_v7 = vld [vmem:[#allocation2] sm:$0xf]  ;;  %v5166_v30 = vld [vmem:[%s6346_s3 + $0x90] sm:$0xff]  }
 0x16d   : > { %v1830_v51 = vor.u32 %v1828_v40, %v1827_v29  ;;  %v1831_v47 = vrot.slane %v1827_v29, 4  ;;  %v4090_v57 = vcombine.low %v5944_v39, %v2271_v33  ;;  %v2406_v63 = vrot.slane %v4097_v37, 1  ;;  %v5957_v8 = vld [vmem:[#allocation2 + $0x4] sm:$0x1]  ;;  %v2060_v28 = vld [vmem:[#allocation2] sm:$0xe] }
 0x16e   : > { %v1835_v52 = vrot.slane %v1833_v41, 7  ;;  %v2337_v19 = vor.u32 %v2336_v48, %v2332_v22  ;;  %v2407_v59 = vrot.slane %v4098_v25, 1  ;;  %v2341_v60 = vshll.u32 %v4089_v50, 16  ;;  %v5984_v32 = vld [vmem:[#allocation2 + $0x8] sm:$0xf]  ;;  %v5164_v55 = vld [vmem:[%s6346_s3 + $0x50] sm:$0xff]  }
 0x16f   : > { %v1896_v61 = vsel %vm5893_vm6, %v1830_v51, %v1895_v43  ;;  %v1899_v62 = vsel %vm5736_vm2, %v1831_v47, %v1898_v45  ;;  %v4151_v9 = vcombine.low %v5911_v38, %v5919_v49  ;;  %v5158_v38 = vld [vmem:[%s6346_s3 + $0x48] sm:$0xff]   ;;  %v2339_v49 = vshrl.u32 %v4089_v50, 16  ;;  %v5165_v41 = vld [vmem:[%s6346_s3 + $0x10] sm:$0xff]  }
 0x170   : > { %v1838_v0 = vor.u32 %v1836_v42, %v1835_v52  ;;  %v1839_v2 = vrot.slane %v1835_v52, 4  ;;  %1897 = vst [vmem:[#allocation2 + $0x38] sm:$0xf] %v1896_v61  ;;  %1900 = vst [vmem:[#allocation2 + $0x3c] sm:$0x1] %v1899_v62  ;;  %v4152_v10 = vcombine.low %v2330_v46, %v2337_v19  ;;  %v4156_v11 = vcombine.low %v2406_v63, %v2407_v59 }
 0x171   : > { %v2343_v13 = vrot.slane %v2341_v60, 1  ;;  %v5964_v14 = vld [vmem:[#allocation2 + $0x28] sm:$0xf]  ;;  %v2272_v16 = vld [vmem:[#allocation2 + $0x2c] sm:$0x1]  ;;  %v2348_v18 = vshll.u32 %v4090_v57, 16  ;;  %v5988_v33 = vcombine.low %v5955_v7, %v5957_v8  ;;  %v4154_v40 = vcombine.low %v5937_v21, %v5944_v39 }
 0x172   : > { %v1902_v44 = vsel %vm5893_vm6, %v1838_v0, %v1901_v54  ;;  %v1905_v17 = vsel %vm5736_vm2, %v1839_v2, %v1904_v58  ;;  %v2280_v56 = vld [vmem:[#allocation2 + $0x28] sm:$0xe]  ;;  %2677 = vmatprep.mubr.bf16.mxu1 %v4152_v10  ;;  %4834 = vmatmul.mubr.bf16.vlgmr.msra.gmra.mrb[48].mxu0 %v4156_v11  ;;  %v5973_v27 = vld [vmem:[#allocation2 + $0x30] sm:$0xf]  ;;  %v2273_v53 = vld [vmem:[#allocation2 + $0x34] sm:$0x1]  ;;  %v4091_v5 = vcombine.low %v5964_v14, %v2272_v16 }
 0x173   : > { %1903 = vst [vmem:[#allocation2 + $0x40] sm:$0xf] %v1902_v44  ;;  %1906 = vst [vmem:[#allocation2 + $0x44] sm:$0x1] %v1905_v17  ;;  %v2281_v20 = vld [vmem:[#allocation2 + $0x30] sm:$0xe]  ;;  %v4099_v22 = vcombine.low %v2280_v56, %v2272_v16  ;;  %2678 = vmatmul.mubr.bf16.vlgmr.msra.gmra.mrb[8].mxu1 %v4151_v9  ;;  %4842 = vmatpush3.bf16.msra.mxu0 %v5865_v3  ;;  %v4092_v15 = vcombine.low %v5973_v27, %v2273_v53 }
 0x174   : > { %v2346_v23 = vshrl.u32 %v4090_v57, 16  ;;  %v2350_v24 = vrot.slane %v2348_v18, 1  ;;  %v4100_v26 = vcombine.low %v2281_v20, %v2273_v53  ;;  %4618 = vmatpush3.bf16.msra.mxu1 %v5154_v4  ;;  %4843 = vmatprep.subr.bf16.mxu0 %v5160_v12  ;;  %v2344_v6 = vor.u32 %v2343_v13, %v2339_v49  ;;  %v2053_v3 = vld [vmem:[#allocation2 + $0xc] sm:$0x1]  ;;  %v2061_v29 = vld [vmem:[#allocation2 + $0x8] sm:$0xe] }
 0x175   : > { %v2355_v31 = vshll.u32 %v4091_v5, 16  ;;  %4619 = vmatprep.subr.bf16.mxu1 %v5158_v38  ;;  %v2408_v35 = vrot.slane %v4099_v22, 1  ;;  %v2362_v37 = vshll.u32 %v4092_v15, 16  ;;  %v2353_v42 = vshrl.u32 %v4091_v5, 16  ;;  %v5171_v21 = vld [vmem:[%s6346_s3 + $0x58] sm:$0xff]   ;;  %v5177_v11 = vld [vmem:[%s6346_s3 + $0xa0] sm:$0xff]  }
 0x176   : > { %v2351_v34 = vor.u32 %v2350_v24, %v2346_v23  ;;  %v2409_v36 = vrot.slane %v4100_v26, 1  ;;  %v4079_v45 = vcombine.low %v2060_v28, %v5957_v8  ;;  %v2360_v25 = vshrl.u32 %v4092_v15, 16  ;;  %v5173_v39 = vld [vmem:[%s6346_s3 + $0x98] sm:$0xff]   ;;  %v5175_v17 = vld [vmem:[%s6346_s3 + $0x60] sm:$0xff]   ;;  %v5189_v15 = vld [vmem:[%s6346_s3 + $0xa8] sm:$0xff]  }
 0x177   : > { %v2357_v43 = vrot.slane %v2355_v31, 1  ;;  %4844 = vmatpush3.bf16.msra.mxu0 %v5160_v12  ;;  %v2364_v50 = vrot.slane %v2362_v37, 1  ;;  %v5999_v51 = vld [vmem:[#allocation2 + $0x38] sm:$0xf]  ;;  %v2274_v47 = vld [vmem:[#allocation2 + $0x3c] sm:$0x1]  ;;  %v6009_v57 = vcombine.low %v5984_v32, %v2053_v3  ;;  %v4080_v58 = vcombine.low %v2061_v29, %v2053_v3 }
 0x178   : > { %v4155_v46 = vcombine.low %v2344_v6, %v2351_v34  ;;  %v4159_v48 = vcombine.low %v2408_v35, %v2409_v36  ;;  %4620 = vmatpush3.bf16.msra.mxu1 %v5159_v1  ;;  %4845 = vmatprep.subr.bf16.mxu0 %v5166_v30  ;;  %v2282_v52 = vld [vmem:[#allocation2 + $0x38] sm:$0xe]  ;;  %v4093_v54 = vcombine.low %v5999_v51, %v2274_v47  ;;  %v2188_v8 = vrot.slane %v4079_v45, 1  ;;  %v6027_v1 = vld [vmem:[#allocation2 + $0x1c] sm:$0x1]  ;;  %v5176_v23 = vld [vmem:[%s6346_s3 + $0x20] sm:$0xff]  }
 0x179   : > { %4621 = vmatprep.subr.bf16.mxu1 %v5164_v55  ;;  %v2358_v19 = vor.u32 %v2357_v43, %v2353_v42  ;;  %v2365_v63 = vor.u32 %v2364_v50, %v2360_v25  ;;  %v4101_v62 = vcombine.low %v2282_v52, %v2274_v47  ;;  %v5172_v10 = vld [vmem:[%s6346_s3 + $0x18] sm:$0xff]   ;;  %v2189_v16 = vrot.slane %v4080_v58, 1  ;;  %v6041_v3 = vld [vmem:[#allocation2 + $0x10] sm:$0xf]  ;;  %v6043_v34 = vld [vmem:[#allocation2 + $0x14] sm:$0x1] }
 0x17a   : > { %2685 = vmatprep.mubr.bf16.mxu1 %v4155_v46  ;;  %v6011_v59 = vld [vmem:[#allocation2 + $0x40] sm:$0xf]  ;;  %v2275_v60 = vld [vmem:[#allocation2 + $0x44] sm:$0x1]  ;;  %4837 = vmatprep.mubr.bf16.mxu0 %v4159_v48  ;;  %v2369_v9 = vshll.u32 %v4093_v54, 16  ;;  %v2111_v49 = vshll.u32 %v5988_v33, 16  ;;  %v4157_v6 = vcombine.low %v5964_v14, %v5973_v27  ;;  %v4073_v29 = vcombine.low %v6041_v3, %v6043_v34 }
 0x17b   : > { %v2283_v61 = vld [vmem:[#allocation2 + $0x40] sm:$0xe]  ;;  %v4094_v0 = vcombine.low %v6011_v59, %v2275_v60  ;;  %2686 = vmatmul.mubr.bf16.gmra.mrb[12].mxu1 %v4154_v40  ;;  %4846 = vmatpush3.bf16.msra.mxu0 %v5166_v30  ;;  %v4158_v4 = vcombine.low %v2358_v19, %v2365_v63  ;;  %v2410_v12 = vrot.slane %v4101_v62, 1  ;;  %v2118_v18 = vshll.u32 %v6009_v57, 16  ;;  %v6025_v22 = vld [vmem:[#allocation2 + $0x18] sm:$0xf] }
 0x17c   : > { %v4102_v2 = vcombine.low %v2283_v61, %v2275_v60  ;;  %4622 = vmatpush3.bf16.msra.mxu1 %v5165_v41  ;;  %4847 = vmatprep.subr.bf16.mxu0 %v5173_v39  ;;  %v2371_v38 = vrot.slane %v2369_v9, 1  ;;  %v2367_v53 = vshrl.u32 %v4093_v54, 16  ;;  %v4189_v24 = vcombine.low %v2188_v8, %v2189_v16  ;;  %v5182_v30 = vld [vmem:[%s6346_s3 + $0x68] sm:$0xff]   ;;  %v5191_v40 = vld [vmem:[%s6346_s3 + $0x70] sm:$0xff]   ;;  %v2063_v41 = vld [vmem:[#allocation2 + $0x18] sm:$0xe] }
 0x17d   : > { %v2376_v44 = vshll.u32 %v4094_v0, 16  ;;  %4623 = vmatprep.subr.bf16.mxu1 %v5171_v21  ;;  %2693 = vmatprep.mubr.bf16.mxu1 %v4158_v4  ;;  %v2374_v20 = vshrl.u32 %v4094_v0, 16  ;;  %v2109_v31 = vshrl.u32 %v5988_v33, 16  ;;  %v2113_v35 = vrot.slane %v2111_v49, 1  ;;  %v5188_v14 = vld [vmem:[%s6346_s3 + $0x28] sm:$0xff]   ;;  %v5193_v33 = vld [vmem:[%s6346_s3 + $0xb0] sm:$0xff]  }
 0x17e   : > { %v2411_v13 = vrot.slane %v4102_v2, 1  ;;  %v2372_v26 = vor.u32 %v2371_v38, %v2367_v53  ;;  %v2120_v36 = vrot.slane %v2118_v18, 1  ;;  %v4074_v37 = vcombine.low %v6025_v22, %v6027_v1  ;;  %v2057_v46 = vld [vmem:[#allocation2 + $0x2c] sm:$0x1]  ;;  %v2065_v48 = vld [vmem:[#allocation2 + $0x28] sm:$0xe] }
 0x17f   : > { %v2378_v5 = vrot.slane %v2376_v44, 1  ;;  %4848 = vmatpush3.bf16.msra.mxu0 %v5173_v39  ;;  %v2116_v27 = vshrl.u32 %v6009_v57, 16  ;;  %v2114_v42 = vor.u32 %v2113_v35, %v2109_v31  ;;  %v2062_v25 = vld [vmem:[#allocation2 + $0x10] sm:$0xe]  ;;  %v6059_v50 = vld [vmem:[#allocation2 + $0x28] sm:$0xf]  ;;  %v4082_v39 = vcombine.low %v2063_v41, %v6027_v1 }
 0x180   : > { %v4162_v56 = vcombine.low %v2410_v12, %v2411_v13  ;;  %4624 = vmatpush3.bf16.msra.mxu1 %v5172_v10  ;;  %4849 = vmatprep.subr.bf16.mxu0 %v5177_v11  ;;  %v2132_v45 = vshll.u32 %v4074_v37, 16  ;;  %v5192_v47 = vld [vmem:[%s6346_s3 + $0x30] sm:$0xff]   ;;  %v2125_v21 = vshll.u32 %v4073_v29, 16  ;;  %v2056_v52 = vld [vmem:[#allocation2 + $0x24] sm:$0x1]  ;;  %v4160_v57 = vcombine.low %v5999_v51, %v6011_v59  ;;  %v5194_v58 = vld [vmem:[%s6346_s3 + $0x78] sm:$0xff]  }
 0x181   : > { %v2379_v28 = vor.u32 %v2378_v5, %v2374_v20  ;;  %4625 = vmatprep.subr.bf16.mxu1 %v5175_v17  ;;  %v2121_v43 = vor.u32 %v2120_v36, %v2116_v27  ;;  %v2064_v54 = vld [vmem:[#allocation2 + $0x20] sm:$0xe]  ;;  %v5196_v19 = vld [vmem:[%s6346_s3 + $0xb8] sm:$0xff]   ;;  %v4084_v60 = vcombine.low %v2065_v48, %v2057_v46  ;;  %v4081_v0 = vcombine.low %v2062_v25, %v6043_v34  ;;  %v2058_v44 = vld [vmem:[#allocation2 + $0x34] sm:$0x1] }
 0x182   : > { %4838 = vmatmul.mubr.bf16.gmra.mrb[52].mxu0 %v4162_v56  ;;  %v6073_v63 = vld [vmem:[#allocation2 + $0x20] sm:$0xf]  ;;  %v2134_v62 = vrot.slane %v2132_v45, 1  ;;  %v6077_v2 = vcombine.low %v6059_v50, %v2057_v46  ;;  %v5195_v51 = vld [vmem:[%s6346_s3 + $0x38] sm:$0xff]   ;;  %v4083_v59 = vcombine.low %v2064_v54, %v2056_v52  ;;  %v2127_v4 = vrot.slane %v2125_v21, 1  ;;  %v5208_v35 = vld [vmem:[%s6346_s3 + $0x1c8] sm:$0xff]  }
 0x183   : > { %4857 = vmatprep.mubr.bf16.mxu0 %v4189_v24  ;;  %v4161_v55 = vcombine.low %v2372_v26, %v2379_v28  ;;  %2694 = vmatmul.mubr.bf16.gmra.mrb[16].mxu1 %v4157_v6  ;;  %v4188_v61 = vcombine.low %v2114_v42, %v2121_v43  ;;  %v2130_v8 = vshrl.u32 %v4074_v37, 16  ;;  %v2191_v9 = vrot.slane %v4082_v39, 1  ;;  %v6085_v10 = vld [vmem:[%s6346_s3 + $0x200] sm:$0xff]   ;;  %v6090_v12 = vld [vmem:[#allocation2 + $0x1c] sm:$0x1]  ;;  %v6114_v27 = vld [vmem:[%s6346_s3 + $0x208] sm:$0xff]  }
 0x184   : > { %4850 = vmatpush3.bf16.msra.mxu0 %v5177_v11  ;;  %4626 = vmatpush3.bf16.msra.mxu1 %v5176_v23  ;;  %v6088_v11 = vcombine.low %v6073_v63, %v2056_v52  ;;  %v5197_v13 = vld [vmem:[%s6346_s3 + $0x1c0] sm:$0xff]   ;;  %v2193_v16 = vrot.slane %v4084_v60, 1  ;;  %v2059_v17 = vld [vmem:[#allocation2 + $0x3c] sm:$0x1]  ;;  %v2067_v38 = vld [vmem:[#allocation2 + $0x38] sm:$0xe]  ;;  %v4187_v34 = vcombine.low %v5955_v7, %v5984_v32 }
 0x185   : > { %4851 = vmatprep.subr.bf16.mxu0 %v5189_v15  ;;  %4627 = vmatprep.subr.bf16.mxu1 %v5182_v30  ;;  %v2123_v49 = vshrl.u32 %v4073_v29, 16  ;;  %v2135_v18 = vor.u32 %v2134_v62, %v2130_v8  ;;  %v2190_v56 = vrot.slane %v4081_v0, 1  ;;  %v2146_v53 = vshll.u32 %v6077_v2, 16  ;;  %v3091_v20 = vld [vmem:[#allocation2 + $0x18] sm:$0xe]  ;;  %v5212_v46 = vld [vmem:[%s6346_s3 + $0x1d0] sm:$0xff]  }
 0x186   : > { %2701 = vmatprep.mubr.bf16.mxu1 %v4161_v55  ;;  %v2192_v5 = vrot.slane %v4083_v59, 1  ;;  %v6096_v1 = vld [vmem:[#allocation2 + $0x38] sm:$0xf]  ;;  %v2066_v23 = vld [vmem:[#allocation2 + $0x30] sm:$0xe]  ;;  %v2139_v28 = vshll.u32 %v6088_v11, 16  ;;  %v4086_v6 = vcombine.low %v2067_v38, %v2059_v17  ;;  %v4232_v37 = vcombine.low %v3091_v20, %v6090_v12 }
 0x187   : > { %v2128_v24 = vor.u32 %v2127_v4, %v2123_v49  ;;  %v4192_v26 = vcombine.low %v2190_v56, %v2191_v9  ;;  %v3082_v30 = vld [vmem:[#allocation2 + $0x14] sm:$0x1]  ;;  %v3090_v31 = vld [vmem:[#allocation2 + $0x10] sm:$0xe]  ;;  %v4078_v7 = vcombine.low %v6096_v1, %v2059_v17  ;;  %v4085_v32 = vcombine.low %v2066_v23, %v2058_v44  ;;  %v6133_v54 = vld [vmem:[#allocation2 + $0x18] sm:$0xf] }
 0x188   : > { %4852 = vmatpush3.bf16.msra.mxu0 %v5189_v15  ;;  %4628 = vmatpush3.bf16.msra.mxu1 %v5188_v14  ;;  %v5202_v15 = vld [vmem:[%s6346_s3 + $0x180] sm:$0xff]   ;;  %v4195_v55 = vcombine.low %v2192_v5, %v2193_v16  ;;  %v6108_v36 = vld [vmem:[#allocation2 + $0x30] sm:$0xf]  ;;  %v4231_v29 = vcombine.low %v3090_v31, %v3082_v30  ;;  %v2141_v41 = vrot.slane %v2139_v28, 1  ;;  %v2144_v42 = vshrl.u32 %v6077_v2, 16  ;;  %v6152_v8 = vld [vmem:[%s6346_s3 + $0x218] sm:$0xff]  }
 0x189   : > { %4853 = vmatprep.subr.bf16.mxu0 %v5193_v33  ;;  %4629 = vmatprep.subr.bf16.mxu1 %v5191_v40  ;;  %v4191_v14 = vcombine.low %v2128_v24, %v2135_v18  ;;  %v5209_v40 = vld [vmem:[%s6346_s3 + $0x188] sm:$0xff]   ;;  %v4077_v43 = vcombine.low %v6108_v36, %v2058_v44  ;;  %v2195_v45 = vrot.slane %v4086_v6, 1  ;;  %v3219_v48 = vrot.slane %v4232_v37, 1  ;;  %v6131_v39 = vld [vmem:[%s6346_s3 + $0x210] sm:$0xff]   ;;  %v5225_v9 = vld [vmem:[%s6346_s3 + $0x198] sm:$0xff]  }
 0x18a   : > { %v2137_v25 = vshrl.u32 %v6088_v11, 16  ;;  %v2194_v21 = vrot.slane %v4085_v32, 1  ;;  %v2160_v52 = vshll.u32 %v4078_v7, 16  ;;  %v4190_v62 = vcombine.low %v6041_v3, %v6025_v22  ;;  %v6141_v0 = vld [vmem:[#allocation2 + $0x10] sm:$0xf]  ;;  %v6166_v17 = vld [vmem:[%s6346_s3 + $0x220] sm:$0xff]  }
 0x18b   : > { %2702 = vmatmul.mubr.bf16.gmra.mrb[20].mxu1 %v4160_v57  ;;  %v3218_v57 = vrot.slane %v4231_v29, 1  ;;  %v4224_v4 = vcombine.low %v6133_v54, %v6090_v12  ;;  %v4223_v3 = vcombine.low %v6141_v0, %v3082_v30  ;;  %v5228_v12 = vld [vmem:[%s6346_s3 + $0x1e0] sm:$0xff]   ;;  %v2151_v16 = vshrl.u32 %v4077_v43, 16  ;;  %v6168_v49 = vld [vmem:[#allocation2 + $0x28] sm:$0xf]  ;;  %v5236_v29 = vld [vmem:[%s6346_s3 + $0x1b0] sm:$0xff]  }
 0x18c   : > { %4854 = vmatpush3.bf16.msra.mxu0 %v5193_v33  ;;  %4630 = vmatpush3.bf16.msra.mxu1 %v5192_v47  ;;  %v2148_v33 = vrot.slane %v2146_v53, 1  ;;  %v4198_v60 = vcombine.low %v2194_v21, %v2195_v45  ;;  %v2162_v22 = vrot.slane %v2160_v52, 1  ;;  %v6170_v18 = vld [vmem:[#allocation2 + $0x2c] sm:$0x1]  ;;  %v5229_v53 = vld [vmem:[%s6346_s3 + $0x1a0] sm:$0xff]   ;;  %v4193_v5 = vcombine.low %v6073_v63, %v6059_v50  ;;  %v5238_v45 = vld [vmem:[%s6346_s3 + $0x1f8] sm:$0xff]  }
 0x18d   : > { %2975 = vmatprep.mubr.bf16.mxu1 %v4188_v61  ;;  %4631 = vmatprep.subr.bf16.mxu1 %v5194_v58  ;;  %v2142_v58 = vor.u32 %v2141_v41, %v2137_v25  ;;  %v2153_v61 = vshll.u32 %v4077_v43, 16  ;;  %v4289_v2 = vcombine.low %v3218_v57, %v3219_v48  ;;  %v3148_v38 = vshll.u32 %v4224_v4, 16  ;;  %v5231_v23 = vld [vmem:[%s6346_s3 + $0x1e8] sm:$0xff]   ;;  %v6181_v24 = vld [vmem:[#allocation2 + $0x20] sm:$0xf]  ;;  %v5239_v57 = vld [vmem:[%s6346_s3 + $0x1b8] sm:$0xff]  }
 0x18e   : > { %4855 = vmatprep.subr.bf16.mxu0 %v5196_v19  ;;  %v2149_v47 = vor.u32 %v2148_v33, %v2144_v42  ;;  %v3141_v20 = vshll.u32 %v4223_v3, 16  ;;  %v6189_v28 = vld [vmem:[%s6346_s3 + $0x228] sm:$0xff]   ;;  %v4226_v50 = vcombine.low %v6168_v49, %v6170_v18  ;;  %v3146_v31 = vshrl.u32 %v4224_v4, 16  ;;  %v6210_v32 = vld [vmem:[#allocation2 + $0x3c] sm:$0x1] }
 0x18f   : > { %v2155_v11 = vrot.slane %v2153_v61, 1  ;;  %v3150_v6 = vrot.slane %v3148_v38, 1  ;;  %v5232_v63 = vld [vmem:[%s6346_s3 + $0x1a8] sm:$0xff]   ;;  %v4196_v43 = vcombine.low %v6108_v36, %v6096_v1  ;;  %v6223_v48 = vld [vmem:[#allocation2 + $0x34] sm:$0x1] }
 0x190   : > { %4856 = vmatpush3.bf16.msra.mxu0 %v5196_v19  ;;  %4632 = vmatpush3.bf16.msra.mxu1 %v5195_v51  ;;  %v5213_v19 = vld [vmem:[%s6346_s3 + $0x190] sm:$0xff]   ;;  %v5224_v51 = vld [vmem:[%s6346_s3 + $0x1d8] sm:$0xff]   ;;  %v4194_v59 = vcombine.low %v2142_v58, %v2149_v47  ;;  %v3143_v30 = vrot.slane %v3141_v20, 1  ;;  %v3162_v33 = vshll.u32 %v4226_v50, 16  ;;  %v3093_v41 = vld [vmem:[#allocation2 + $0x28] sm:$0xe] }
 0x191   : > { %4865 = vmatprep.subr.bf16.mxu0 %v6085_v10  ;;  %4669 = vmatprep.subr.bf16.mxu1 %v5197_v13  ;;  %v2158_v13 = vshrl.u32 %v4078_v7, 16  ;;  %v2156_v56 = vor.u32 %v2155_v11, %v2151_v16  ;;  %v3151_v37 = vor.u32 %v3150_v6, %v3146_v31  ;;  %v6208_v7 = vld [vmem:[#allocation2 + $0x38] sm:$0xf]  ;;  %v3092_v21 = vld [vmem:[#allocation2 + $0x20] sm:$0xe]  ;;  %v4234_v36 = vcombine.low %v3093_v41, %v6170_v18 }
 0x192   : > { %v6229_v47 = vld [vmem:[%s6346_s3 + $0x238] sm:$0xff]   ;;  %v3164_v52 = vrot.slane %v3162_v33, 1  ;;  %v4228_v1 = vcombine.low %v6208_v7, %v6210_v32  ;;  %v6244_v4 = vld [vmem:[#allocation2 + $0x4c] sm:$0x1]  ;;  %v4290_v6 = vcombine.low %v6181_v24, %v6168_v49  ;;  %v3096_v33 = vld [vmem:[#allocation2 + $0x40] sm:$0xe] }
 0x193   : > { %4858 = vmatmul.mubr.bf16.vlgmr.msra.gmra.mrb[48].mxu0 %v4192_v26  ;;  %2976 = vmatmul.mubr.bf16.vlgmr.msra.gmra.mrb[24].mxu1 %v4187_v34  ;;  %v2163_v44 = vor.u32 %v2162_v22, %v2158_v13  ;;  %v3221_v22 = vrot.slane %v4234_v36, 1 }
 0x194   : > { %4861 = vmatprep.mubr.bf16.mxu0 %v4195_v55  ;;  %2983 = vmatprep.mubr.bf16.mxu1 %v4191_v14  ;;  %v5235_v55 = vld [vmem:[%s6346_s3 + $0x1f0] sm:$0xff]  }
 0x195   : > { %4670 = vmatpush3.bf16.msra.mxu1 %v5202_v15  ;;  %4866 = vmatpush3.bf16.msra.mxu0 %v6085_v10  ;;  %v6183_v15 = vld [vmem:[#allocation2 + $0x24] sm:$0x1]  ;;  %v4197_v26 = vcombine.low %v2156_v56, %v2163_v44  ;;  %v6206_v14 = vld [vmem:[%s6346_s3 + $0x230] sm:$0xff]  }
 0x196   : > { %4671 = vmatprep.subr.bf16.mxu1 %v5208_v35  ;;  %4867 = vmatprep.subr.bf16.mxu0 %v6114_v27  ;;  %v4225_v34 = vcombine.low %v6181_v24, %v6183_v15  ;;  %v3139_v35 = vshrl.u32 %v4223_v3, 16  ;;  %v4233_v61 = vcombine.low %v3092_v21, %v6183_v15  ;;  %v3080_v3 = vld [vmem:[#allocation2 + $0x40] sm:$0xf]  ;;  %v3094_v24 = vld [vmem:[#allocation2 + $0x30] sm:$0xe] }
 0x198   : > { %v3155_v42 = vshll.u32 %v4225_v34, 16  ;;  %v3220_v16 = vrot.slane %v4233_v61, 1 }
 0x199   : > { %4672 = vmatpush3.bf16.msra.mxu1 %v5209_v40  ;;  %4868 = vmatpush3.bf16.msra.mxu0 %v6114_v27  ;;  %v3144_v40 = vor.u32 %v3143_v30, %v3139_v35 }
 0x19a   : > { %4673 = vmatprep.subr.bf16.mxu1 %v5212_v46  ;;  %4869 = vmatprep.subr.bf16.mxu0 %v6131_v39  ;;  %v6221_v46 = vld [vmem:[#allocation2 + $0x30] sm:$0xf]  ;;  %v3157_v58 = vrot.slane %v3155_v42, 1 }
 0x19b   : > { %4862 = vmatmul.mubr.bf16.gmra.mrb[52].mxu0 %v4198_v60  ;;  %2984 = vmatmul.mubr.bf16.gmra.mrb[28].mxu1 %v4190_v62  ;;  %v4288_v25 = vcombine.low %v3144_v40, %v3151_v37  ;;  %v4227_v60 = vcombine.low %v6221_v46, %v6223_v48  ;;  %v3153_v62 = vshrl.u32 %v4225_v34, 16  ;;  %v4293_v49 = vcombine.low %v6221_v46, %v6208_v7 }
 0x19c   : > { %4881 = vmatprep.mubr.bf16.mxu0 %v4289_v2  ;;  %2991 = vmatprep.mubr.bf16.mxu1 %v4194_v59  ;;  %v6242_v59 = vld [vmem:[#allocation2 + $0x48] sm:$0xf] }
 0x19d   : > { %4674 = vmatpush3.bf16.msra.mxu1 %v5213_v19  ;;  %4870 = vmatpush3.bf16.msra.mxu0 %v6131_v39  ;;  %v3160_v19 = vshrl.u32 %v4226_v50, 16  ;;  %v3158_v11 = vor.u32 %v3157_v58, %v3153_v62  ;;  %v3169_v13 = vshll.u32 %v4227_v60, 16  ;;  %v4230_v56 = vcombine.low %v6242_v59, %v6244_v4 }
 0x19e   : > { %4675 = vmatprep.subr.bf16.mxu1 %v5224_v51  ;;  %4871 = vmatprep.subr.bf16.mxu0 %v6152_v8  ;;  %v3176_v51 = vshll.u32 %v4228_v1, 16 }
 0x19f   : > { %v3165_v2 = vor.u32 %v3164_v52, %v3160_v19  ;;  %v3171_v20 = vrot.slane %v3169_v13, 1  ;;  %v3190_v15 = vshll.u32 %v4230_v56, 16  ;;  %v4323_v13 = vld [vmem:[%s6347_s4] ss:$0 sm:$0xff] }
 0x1a0   : > { %v3178_v38 = vrot.slane %v3176_v51, 1 }
 0x1a1   : > { %4676 = vmatpush3.bf16.msra.mxu1 %v5225_v9  ;;  %4872 = vmatpush3.bf16.msra.mxu0 %v6152_v8  ;;  %v6246_v9 = vld [vmem:[#allocation2 + $0x44] sm:$0x1]  ;;  %v4291_v44 = vcombine.low %v3158_v11, %v3165_v2  ;;  %v3192_v30 = vrot.slane %v3190_v15, 1 }
 0x1a2   : > { %4677 = vmatprep.subr.bf16.mxu1 %v5228_v12  ;;  %4873 = vmatprep.subr.bf16.mxu0 %v6166_v17  ;;  %v4287_v12 = vcombine.low %v6141_v0, %v6133_v54  ;;  %v4229_v18 = vcombine.low %v3080_v3, %v6246_v9  ;;  %v3167_v54 = vshrl.u32 %v4227_v60, 16  ;;  %v4237_v40 = vcombine.low %v3096_v33, %v6246_v9 }
 0x1a3   : > { %2992 = vmatmul.mubr.bf16.gmra.mrb[32].mxu1 %v4193_v5  ;;  %v3174_v5 = vshrl.u32 %v4228_v1, 16 }
 0x1a4   : > { %2999 = vmatprep.mubr.bf16.mxu1 %v4197_v26  ;;  %v3172_v26 = vor.u32 %v3171_v20, %v3167_v54  ;;  %v3181_v31 = vshrl.u32 %v4229_v18, 16 }
 0x1a5   : > { %4678 = vmatpush3.bf16.msra.mxu1 %v5229_v53  ;;  %4874 = vmatpush3.bf16.msra.mxu0 %v6166_v17  ;;  %v4292_v53 = vcombine.low %v3220_v16, %v3221_v22  ;;  %v3179_v0 = vor.u32 %v3178_v38, %v3174_v5 }
 0x1a6   : > { %4679 = vmatprep.subr.bf16.mxu1 %v5231_v23  ;;  %4875 = vmatprep.subr.bf16.mxu0 %v6189_v28  ;;  %v3183_v23 = vshll.u32 %v4229_v18, 16 }
 0x1a7   : > { %v4294_v50 = vcombine.low %v3172_v26, %v3179_v0 }
 0x1a9   : > { %4680 = vmatpush3.bf16.msra.mxu1 %v5232_v63  ;;  %4876 = vmatpush3.bf16.msra.mxu0 %v6189_v28  ;;  %v3185_v63 = vrot.slane %v3183_v23, 1 }
 0x1aa   : > { %4681 = vmatprep.subr.bf16.mxu1 %v5235_v55  ;;  %4877 = vmatprep.subr.bf16.mxu0 %v6206_v14 }
 0x1ab   : > { %3000 = vmatmul.mubr.bf16.gmra.mrb[36].mxu1 %v4196_v43  ;;  %v3186_v34 = vor.u32 %v3185_v63, %v3181_v31 }
 0x1ac   : > { %3491 = vmatprep.mubr.bf16.mxu1 %v4288_v25 }
 0x1ad   : > { %4682 = vmatpush3.bf16.msra.mxu1 %v5236_v29  ;;  %4878 = vmatpush3.bf16.msra.mxu0 %v6206_v14  ;;  %v3097_v29 = vld [vmem:[#allocation2 + $0x48] sm:$0xe] }
 0x1ae   : > { %4683 = vmatprep.subr.bf16.mxu1 %v5238_v45  ;;  %4879 = vmatprep.subr.bf16.mxu0 %v6229_v47  ;;  %v4238_v41 = vcombine.low %v3097_v29, %v6244_v4 }
 0x1b0   : > { %v3225_v43 = vrot.slane %v4238_v41, 1 }
 0x1b1   : > { %4684 = vmatpush3.bf16.msra.mxu1 %v5239_v57  ;;  %4880 = vmatpush3.bf16.msra.mxu0 %v6229_v47 }
 0x1b2   : > { %4889 = vmatprep.subr.bf16.mxu1 %v6085_v10 }
 0x1b4   : > { %3492 = vmatmul.mubr.bf16.vlgmr.msra.gmra.mrb[40].mxu1 %v4287_v12  ;;  %4882 = vmatmul.mubr.bf16.vlgmr.msra.gmra.mrb[48].mxu0 %v4292_v53 }
 0x1b5   : > { %3499 = vmatprep.mubr.bf16.mxu1 %v4291_v44  ;;  %4897 = vmatpush3.bf16.msra.mxu1 %v6085_v10  ;;  %v3188_v10 = vshrl.u32 %v4230_v56, 16 }
 0x1b6   : > { %4890 = vmatprep.subr.bf16.mxu1 %v6114_v27 }
 0x1b7   : > { %v3193_v55 = vor.u32 %v3192_v30, %v3188_v10 }
 0x1b9   : > { %4898 = vmatpush3.bf16.msra.mxu1 %v6114_v27  ;;  %v3095_v27 = vld [vmem:[#allocation2 + $0x38] sm:$0xe]  ;;  %v4297_v35 = vcombine.low %v3186_v34, %v3193_v55 }
 0x1ba   : > { %4891 = vmatprep.subr.bf16.mxu1 %v6131_v39  ;;  %v4236_v37 = vcombine.low %v3095_v27, %v6210_v32  ;;  %v4296_v32 = vcombine.low %v3080_v3, %v6242_v59 }
 0x1bc   : > { %3500 = vmatmul.mubr.bf16.gmra.mrb[44].mxu1 %v4290_v6 }
 0x1bd   : > { %3507 = vmatprep.mubr.bf16.mxu1 %v4294_v50  ;;  %4899 = vmatpush3.bf16.msra.mxu1 %v6131_v39  ;;  %v4235_v39 = vcombine.low %v3094_v24, %v6223_v48 }
 0x1be   : > { %4892 = vmatprep.subr.bf16.mxu1 %v6152_v8 }
 0x1bf   : > { %v3222_v7 = vrot.slane %v4235_v39, 1 }
 0x1c1   : > { %4900 = vmatpush3.bf16.msra.mxu1 %v6152_v8  ;;  %v3223_v8 = vrot.slane %v4236_v37, 1 }
 0x1c2   : > { %4893 = vmatprep.subr.bf16.mxu1 %v6166_v17 }
 0x1c3   : > { %v4295_v42 = vcombine.low %v3222_v7, %v3223_v8 }
 0x1c4   : > { %3508 = vmatmul.mubr.bf16.gmra.mrb[48].mxu1 %v4293_v49 }
 0x1c5   : > { %3515 = vmatprep.mubr.bf16.mxu1 %v4297_v35  ;;  %4901 = vmatpush3.bf16.msra.mxu1 %v6166_v17  ;;  %v3224_v17 = vrot.slane %v4237_v40, 1 }
 0x1c6   : > { %4894 = vmatprep.subr.bf16.mxu1 %v6189_v28 }
 0x1c9   : > { %4902 = vmatpush3.bf16.msra.mxu1 %v6189_v28  ;;  %v4298_v28 = vcombine.low %v3224_v17, %v3225_v43 }
 0x1ca   : > { %4895 = vmatprep.subr.bf16.mxu1 %v6206_v14 }
 0x1cc   : > { %3516 = vmatmul.mubr.bf16.gmra.mrb[52].mxu1 %v4296_v32 }
 0x1cd   : > { %4903 = vmatpush3.bf16.msra.mxu1 %v6206_v14  ;;  %4885 = vmatprep.mubr.bf16.mxu1 %v4295_v42 }
 0x1ce   : > { %4896 = vmatprep.subr.bf16.mxu1 %v6229_v47 }
 0x1d1   : > { %4904 = vmatpush3.bf16.msra.mxu1 %v6229_v47 }
 0x1d4   : > { %4886 = vmatmul.mubr.bf16.vlgmr.msra.gmra.mrb[56].mxu1 %v4298_v28 }
 0x246   : > { %v4581_v45 = vpop.f32.mrb[8].mxu1 }
 0x247   : > { %v4582_v46 = vpop.f32.mrb[9].mxu1 }
 0x248   : > { %v4583_v48 = vadd.f32 %v4582_v46, %v4581_v45  ;;  %v4584_v25 = vpop.f32.mrb[10].mxu1 }
 0x249   : > { %v4585_v21 = vpop.f32.mrb[11].mxu1 }
 0x24a   : > { %v4586_v52 = vadd.f32 %v4585_v21, %v4584_v25  ;;  %v4933_v44 = vadd.f32 %v4583_v48, %v4323_v13 }
 0x24c   : > { %v4941_v53 = vadd.f32 %v4586_v52, %v4323_v13 }
 0x24e   : > { %v4587_v1 = vpop.f32.mrb[12].mxu1 }
 0x24f   : > { %v4588_v36 = vpop.f32.mrb[13].mxu1 }
 0x250   : > { %v4589_v57 = vadd.f32 %v4588_v36, %v4587_v1  ;;  %v4590_v58 = vpop.f32.mrb[14].mxu1 }
 0x251   : > { %v4591_v14 = vpop.f32.mrb[15].mxu1 }
 0x252   : > { %v4592_v19 = vadd.f32 %v4591_v14, %v4590_v58  ;;  %v4929_v50 = vadd.f32 %v4589_v57, %v4323_v13 }
 0x254   : > { %v4937_v34 = vadd.f32 %v4592_v19, %v4323_v13 }
 0x256   : > { %v4593_v60 = vpop.f32.mrb[16].mxu1 }
 0x257   : > { %v4594_v61 = vpop.f32.mrb[17].mxu1 }
 0x258   : > { %v4595_v62 = vadd.f32 %v4594_v61, %v4593_v60  ;;  %v4596_v2 = vpop.f32.mrb[18].mxu1 }
 0x259   : > { %v4597_v51 = vpop.f32.mrb[19].mxu1 }
 0x25a   : > { %v4598_v47 = vadd.f32 %v4597_v51, %v4596_v2  ;;  %v4950_v37 = vadd.f32 %v4595_v62, %v4323_v13 }
 0x25c   : > { %v4960_v8 = vadd.f32 %v4598_v47, %v4323_v13 }
 0x25e   : > { %v4599_v59 = vpop.f32.mrb[20].mxu1 }
 0x25f   : > { %v4600_v4 = vpop.f32.mrb[21].mxu1 }
 0x260   : > { %v4601_v22 = vadd.f32 %v4600_v4, %v4599_v59  ;;  %v4602_v3 = vpop.f32.mrb[22].mxu1 }
 0x261   : > { %v4603_v9 = vpop.f32.mrb[23].mxu1 }
 0x262   : > { %v4604_v11 = vadd.f32 %v4603_v9, %v4602_v3  ;;  %v4945_v28 = vadd.f32 %v4601_v22, %v4323_v13 }
 0x264   : > { %v4955_v25 = vadd.f32 %v4604_v11, %v4323_v13 }
 0x266   : > { %v4633_v12 = vpop.f32.mrb[24].mxu1 }
 0x267   : > { %v4634_v16 = vpop.f32.mrb[25].mxu1 }
 0x268   : > { %v4635_v38 = vadd.f32 %v4634_v16, %v4633_v12  ;;  %v4636_v18 = vpop.f32.mrb[26].mxu1 }
 0x269   : > { %v4637_v56 = vpop.f32.mrb[27].mxu1 }
 0x26a   : > { %v4934_v20 = vadd.f32 %v4933_v44, %v4635_v38  ;;  %v4638_v5 = vadd.f32 %v4637_v56, %v4636_v18 }
 0x26c   : > { %v4942_v54 = vadd.f32 %v4941_v53, %v4638_v5 }
 0x26e   : > { %v4863_v0 = vpop.f32.mrb[52].mxu0  ;;  %v4639_v23 = vpop.f32.mrb[28].mxu1 }
 0x26f   : > { %v3058_v15 = vpop.f32.mrb[53].mxu0  ;;  %v4640_v26 = vpop.f32.mrb[29].mxu1 }
 0x270   : > { %v4864_v6 = vpop.f32.mrb[54].mxu0  ;;  %v4641_v63 = vadd.f32 %v4640_v26, %v4639_v23  ;;  %v4642_v10 = vpop.f32.mrb[30].mxu1 }
 0x271   : > { %v3061_v30 = vpop.f32.mrb[55].mxu0  ;;  %v4643_v31 = vpop.f32.mrb[31].mxu1 }
 0x272   : > { %v4930_v55 = vadd.f32 %v4929_v50, %v4641_v63  ;;  %v4644_v27 = vadd.f32 %v4643_v31, %v4642_v10 }
 0x274   : > { %v4938_v49 = vadd.f32 %v4937_v34, %v4644_v27 }
 0x276   : > { %v4645_v24 = vpop.f32.mrb[32].mxu1 }
 0x277   : > { %v4646_v35 = vpop.f32.mrb[33].mxu1 }
 0x278   : > { %v4647_v39 = vadd.f32 %v4646_v35, %v4645_v24  ;;  %v4648_v33 = vpop.f32.mrb[34].mxu1 }
 0x279   : > { %v4649_v29 = vpop.f32.mrb[35].mxu1 }
 0x27a   : > { %v4951_v7 = vadd.f32 %v4950_v37, %v4647_v39  ;;  %v4650_v40 = vadd.f32 %v4649_v29, %v4648_v33 }
 0x27c   : > { %v4961_v41 = vadd.f32 %v4960_v8, %v4650_v40  ;;  %v4952_v32 = vadd.f32 %v4951_v7, %v3058_v15 }
 0x27e   : > { %v4651_v42 = vpop.f32.mrb[36].mxu1  ;;  %v4962_v17 = vadd.f32 %v4961_v41, %v3061_v30 }
 0x27f   : > { %v4652_v43 = vpop.f32.mrb[37].mxu1 }
 0x280   : > { %v4653_v45 = vadd.f32 %v4652_v43, %v4651_v42  ;;  %v4654_v46 = vpop.f32.mrb[38].mxu1 }
 0x281   : > { %v4655_v48 = vpop.f32.mrb[39].mxu1 }
 0x282   : > { %v4946_v21 = vadd.f32 %v4945_v28, %v4653_v45  ;;  %v4656_v52 = vadd.f32 %v4655_v48, %v4654_v46 }
 0x284   : > { %v4956_v1 = vadd.f32 %v4955_v25, %v4656_v52  ;;  %v4947_v36 = vadd.f32 %v4946_v21, %v4863_v0 }
 0x286   : > { %v4957_v58 = vadd.f32 %v4956_v1, %v4864_v6 }
 0x287   : > { %v4685_v57 = vpop.f32.mrb[40].mxu1  ;;  %v4883_v61 = vpop.f32.mrb[48].mxu0 }
 0x288   : > { %v4686_v14 = vpop.f32.mrb[41].mxu1  ;;  %v3558_v2 = vpop.f32.mrb[49].mxu0 }
 0x289   : > { %v4687_v19 = vadd.f32 %v4686_v14, %v4685_v57  ;;  %v4688_v60 = vpop.f32.mrb[42].mxu1  ;;  %v4884_v59 = vpop.f32.mrb[50].mxu0 }
 0x28a   : > { %v4689_v62 = vpop.f32.mrb[43].mxu1  ;;  %v3561_v4 = vpop.f32.mrb[51].mxu0 }
 0x28b   : > { %v4690_v51 = vadd.f32 %v4689_v62, %v4688_v60  ;;  %v4935_v47 = vadd.f32 %v4934_v20, %v4687_v19 }
 0x28d   : > { %v4936_v22 = vadd.f32 %v4935_v47, %v3558_v2  ;;  %v4943_v3 = vadd.f32 %v4942_v54, %v4690_v51 }
 0x28f   : > { %v4944_v9 = vadd.f32 %v4943_v3, %v3561_v4  ;;  %v4691_v11 = vpop.f32.mrb[44].mxu1  ;;  %v3627_v12 = vmax.f32 %v4936_v22, 0.0 }
 0x290   : > { %v4692_v13 = vpop.f32.mrb[45].mxu1 }
 0x291   : > { %v3628_v16 = vmax.f32 %v4944_v9, 0.0  ;;  %v4693_v44 = vadd.f32 %v4692_v13, %v4691_v11  ;;  %v4694_v38 = vpop.f32.mrb[46].mxu1 }
 0x292   : > { %v4695_v18 = vpop.f32.mrb[47].mxu1 }
 0x293   : > { %v4377_v56 = vpack.c.bf16 %v3628_v16, %v3627_v12  ;;  %v4931_v53 = vadd.f32 %v4930_v55, %v4693_v44  ;;  %v4696_v5 = vadd.f32 %v4695_v18, %v4694_v38 }
 0x295   : > { %4378 = vst [vmem:[%s6285_s16] sm:$0xff] %v4377_v56   ;;  %v4932_v20 = vadd.f32 %v4931_v53, %v4883_v61  ;;  %v4939_v54 = vadd.f32 %v4938_v49, %v4696_v5 }
 0x297   : > { %v4940_v0 = vadd.f32 %v4939_v54, %v4884_v59  ;;  %v4697_v23 = vpop.f32.mrb[48].mxu1  ;;  %v3629_v26 = vmax.f32 %v4932_v20, 0.0 }
 0x298   : > { %v4698_v15 = vpop.f32.mrb[49].mxu1 }
 0x299   : > { %v3630_v6 = vmax.f32 %v4940_v0, 0.0  ;;  %v4699_v50 = vadd.f32 %v4698_v15, %v4697_v23  ;;  %v4700_v63 = vpop.f32.mrb[50].mxu1 }
 0x29a   : > { %v4701_v10 = vpop.f32.mrb[51].mxu1 }
 0x29b   : > { %v4382_v30 = vpack.c.bf16 %v3630_v6, %v3629_v26  ;;  %v4702_v31 = vadd.f32 %v4701_v10, %v4700_v63  ;;  %v4953_v34 = vadd.f32 %v4952_v32, %v4699_v50 }
 0x29d   : > { %4394 = vst [vmem:[%s6285_s16 + $0x8] sm:$0xff] %v4382_v30   ;;  %v4963_v55 = vadd.f32 %v4962_v17, %v4702_v31 }
 0x29f   : > { %v4703_v27 = vpop.f32.mrb[52].mxu1 }
 0x2a0   : > { %v4704_v24 = vpop.f32.mrb[53].mxu1 }
 0x2a1   : > { %v4705_v35 = vadd.f32 %v4704_v24, %v4703_v27  ;;  %v4706_v37 = vpop.f32.mrb[54].mxu1 }
 0x2a2   : > { %v4707_v49 = vpop.f32.mrb[55].mxu1 }
 0x2a3   : > { %v4708_v39 = vadd.f32 %v4707_v49, %v4706_v37  ;;  %v4948_v33 = vadd.f32 %v4947_v36, %v4705_v35 }
 0x2a5   : > { %v4958_v29 = vadd.f32 %v4957_v58, %v4708_v39 }
 0x2a7   : > { %v4887_v8 = vpop.f32.mrb[56].mxu1 }
 0x2a8   : > { %v4949_v7 = vadd.f32 %v4948_v33, %v4887_v8  ;;  %v3574_v40 = vpop.f32.mrb[57].mxu1 }
 0x2a9   : > { %v4954_v41 = vadd.f32 %v4953_v34, %v3574_v40  ;;  %v4888_v42 = vpop.f32.mrb[58].mxu1 }
 0x2aa   : > { %v4959_v32 = vadd.f32 %v4958_v29, %v4888_v42  ;;  %v3577_v17 = vpop.f32.mrb[59].mxu1  ;;  %v3633_v28 = vmax.f32 %v4949_v7, 0.0 }
 0x2ab   : > { %v4964_v43 = vadd.f32 %v4963_v55, %v3577_v17  ;;  %v3631_v46 = vmax.f32 %v4954_v41, 0.0 }
 0x2ac   : > { %v3634_v45 = vmax.f32 %v4959_v32, 0.0 }
 0x2ad   : > { %v3632_v48 = vmax.f32 %v4964_v43, 0.0 }
 0x2ae   : > { %v4392_v25 = vpack.c.bf16 %v3634_v45, %v3633_v28 }
 0x2af   : > { %v4387_v21 = vpack.c.bf16 %v3632_v48, %v3631_v46 }
 0x2b0   : > { %4396 = vst [vmem:[%s6285_s16 + $0x18] sm:$0xff] %v4392_v25  }
 0x2b1   : > { %4395 = vst [vmem:[%s6285_s16 + $0x10] sm:$0xff] %v4387_v21  }
 0x2b2   : > { %5269 = shalt.err (!%p5266_p3)
}
 0x2b3   : > { %s5270_s11 = scalar_lea.hbm %s6296_s20, 512  ;;  %s5274_s14 = scalar_lea.hbm %s6349_s6, 1024 }
 0x2b4   : > { %p5271_p4 = scmp.ne.s32.totalorder %s6296_s20, %s5270_s11  ;;  %p5275_p9 = scmp.lt.u32.totalorder %s6296_s20, %s6349_s6 }
 0x2b5   : > { %p5276_p10 = scmp.lt.u32.totalorder %s5274_s14, %s5270_s11  ;;  %p5278_p12 = scmp.lt.u32.totalorder %s5270_s11, %s6296_s20 }
 0x2b6   : > { %p5272_p7 = pnand %p5271_p4, %p5397_p5 }
 0x2b7   : > { %p5277_p11 = por %p5276_p10, %p5275_p9 }
 0x2b8   : > { %p5273_p8 = pneg %p5272_p7 }
 0x2b9   : > { %p5279_p13 = por %p5278_p12, %p5277_p11 }
 0x2bb   : > { %p5280_p0 = pnand %p5279_p13, %p5273_p8 }
 0x2bd   : > { %5283 = shalt.err (!%p5280_p0)
}
 0x2be   : > { %s5322_s18 = smov 64   ;;  %s5323_s19 = smov 4  }
 0x2bf   : > { %5002 = dma.vmem_to_hbm [thread:$0]  (%p5397_p5), %s6291_s17, 512, %s6296_s20, %s6302_s26, %s5322_s18, %s5322_s18, %s5323_s19  }
 0x2c0 PF: > { %p5008_p1 = scmp.ge.s32.totalorder %s5318_s24, 2  ;;  %s3680_s28 = sand.u32 1, %s5306_s21  }
 0x2c1   : > { %s3681_s25 = scalar_lea.sflag [#allocation5], %s3680_s28 }
 0x2c2   : > { %p5005_p2 = pnand %p5008_p1, %p5401_p6 }
 0x2c4   : > { %5301 = dma.done.wait (!%p5005_p2), %s3681_s25, 512  }
 0x2c5   : > { %5303 = vsyncadd (!%p5005_p2), %s3681_s25, 4294966784  ;;  %p16_p3 = scmp.ge.s32.totalorder %s5384_s27, 4   ;;  %s6358_s21 = smov %s5310_s22 }
 0x2c6   : > { %s6359_s22 = smov %s5314_s23  ;;  %s6360_s23 = smov %s5395_s30 }
 0x2c7   : > { %s6361_s24 = smov %s5384_s27  ;;  %18 = sbr.rel (!%p16_p3) target bundleno = 3 (0x3), region = 157 }
 0x2ce   :  { %3686 = vsyncpa [#allocation5], 1 }
 0x2cf   :  { %3688 = vsyncpa [#allocation5 + $0x1], 1 }

</bundles_post_ra>
